<compile_context>
chip_gen: v5e
topology: v5e:2x2
jax: 0.10.0
libtpu: 0.0.40
codegen_flags: <defaults>
</compile_context>

<pallas_src>
import math
import jax
import jax.numpy as jnp
from jax.experimental import pallas as pl
from jax.experimental.pallas import tpu as pltpu

_LANE = 128      # lane width / pad for the folded attention column block
_SUBLANE = 8     # f32 sublane count


def _round_up(x, m):
    return ((x + m - 1) // m) * m


def encoder_kernel(x_ref, sx_ref, wih_ref, wp_ref, b_ref, xtilde_ref, xenc_ref):
    B = x_ref.shape[0]
    N = sx_ref.shape[1]
    fourH = wih_ref.shape[1]
    H = fourH // 4
    Tm1 = x_ref.shape[1] // N

    Xf = x_ref[...]                                    # (B, Tm1*N)  lane-flattened driving series
    scores_x = sx_ref[...]                             # (B, N)      loop-invariant attn term (+ bias)
    wih = wih_ref[...]                                 # (N, 4H)   = weight_ih_l0.T
    wp = wp_ref[...]                                   # (2H, 4H+LANE) folded [whh.T | attn col x N]
    b_full = jnp.broadcast_to(b_ref[...], (B, fourH))  # hoisted bias broadcast (bias_ih + bias_hh)

    h = jnp.zeros((B, H), jnp.float32)
    c = jnp.zeros((B, H), jnp.float32)

    xt_list = []
    xe_list = []
    # Fully unrolled: Tm1 is small here.  See TODO at top for larger Tm1.
    for t in range(Tm1):
        # One MXU dot gives both h@whh.T (gate contribution) and the attention logit
        # w_h.h + w_s.s, pre-replicated across N lanes (columns 4H:4H+N of wp).
        hc = jnp.concatenate([h, c], axis=1)                              # (B, 2H)
        combo = jnp.dot(hc, wp, preferred_element_type=jnp.float32)       # (B, 4H + LANE)
        gates_h = combo[:, :fourH]                                        # (B, 4H)

        # attention logits + softmax over the driving-series axis (no lane broadcast needed)
        e = scores_x + combo[:, fourH:fourH + N]                          # (B, N)
        m = jnp.max(e, axis=-1, keepdims=True)
        p = jnp.exp(e - m)
        # approx reciprocal: alpha sums to 1 within ~1e-3; fine at these sequence lengths.
        alpha = p * pl.reciprocal(jnp.sum(p, axis=-1, keepdims=True), approx=True)

        x_tilde = alpha * Xf[:, t * N:(t + 1) * N]                        # (B, N) static lane slice

        # single LSTM step (PyTorch gate order: i, f, g, o)
        gates = (jnp.dot(x_tilde, wih, preferred_element_type=jnp.float32)
                 + gates_h + b_full)                                      # (B, 4H)
        sig = jax.nn.sigmoid(gates)              # one EUP push covers i, f and o gates
        i_g = sig[:, 0 * H:1 * H]
        f_g = sig[:, 1 * H:2 * H]
        o_g = sig[:, 3 * H:4 * H]
        g_g = jnp.tanh(gates[:, 2 * H:3 * H])
        c = f_g * c + i_g * g_g
        h = o_g * jnp.tanh(c)

        xt_list.append(x_tilde)
        xe_list.append(h)

    # single lane-dense (>=128-wide, unmasked) store per output after the recurrence
    xt_pad = xtilde_ref.shape[1] - Tm1 * N
    if xt_pad > 0:
        xt_list.append(jnp.zeros((B, xt_pad), jnp.float32))
    xe_pad = xenc_ref.shape[1] - Tm1 * H
    if xe_pad > 0:
        xe_list.append(jnp.zeros((B, xe_pad), jnp.float32))
    xtilde_ref[...] = jnp.concatenate(xt_list, axis=1)                    # (B, XT_W)
    xenc_ref[...] = jnp.concatenate(xe_list, axis=1)                      # (B, XE_W)


def encoder_pallas(X, w_ih, w_hh, b_ih, b_hh, attn_w, attn_b, *, batch_tile=None):
    """X: (B, T-1, N) float32. Weight shapes follow the PyTorch module."""
    B, Tm1, N = X.shape
    H = w_hh.shape[1]
    fourH = 4 * H

    # --- sublane-pad the batch to a multiple of 8 so every vreg row is used -------------
    B_pad = _round_up(B, _SUBLANE)
    X_p = X.astype(jnp.float32)
    if B_pad != B:
        X_p = jnp.concatenate(
            [X_p, jnp.zeros((B_pad - B, Tm1, N), jnp.float32)], axis=0)

    # --- batch tile: on v7x split the padded batch across the two TensorCores ----------
    if batch_tile is None:
        kind = jax.devices()[0].device_kind.lower()
        if ("v7" in kind or "7x" in kind) and B_pad >= 2 * _SUBLANE:
            tb = B_pad // 2
        else:
            tb = B_pad
    else:
        tb = batch_tile
    assert B_pad % tb == 0 and tb % _SUBLANE == 0, "batch tile must be a multiple of 8 dividing padded batch"
    # NOTE: at large tb re-derive the VMEM budget (v7x has 64 MiB physical / 32 MiB scoped
    # default) and pass vmem_limit_bytes via pltpu.CompilerParams if needed.

    # --- weight prep ---------------------------------------------------------------------
    # TODO(synk): bf16 casting of the matmul operands cuts MXU pass count but must be
    #             re-validated (recurrence amplifies rounding error); keeping f32 here.
    w_ih_t = jnp.transpose(w_ih).astype(jnp.float32)              # (N, 4H)
    b_comb = (b_ih + b_hh).reshape(1, fourH).astype(jnp.float32)

    # Folded weight: columns [0:4H] = whh.T on the h rows; columns [4H:4H+N] all carry the
    # attention projection [w_attn_h ; w_attn_s], so the per-step dot emits the attention
    # logit already broadcast over the N driving series.
    wp = jnp.zeros((2 * H, fourH + _LANE), jnp.float32)
    wp = wp.at[:H, :fourH].set(jnp.transpose(w_hh).astype(jnp.float32))
    attn_hs = attn_w[0, :2 * H].astype(jnp.float32)               # (2H,)
    wp = wp.at[:, fourH:fourH + N].set(
        jnp.broadcast_to(attn_hs[:, None], (2 * H, N)))

    # Loop-invariant attention contribution of the driving series (+ attention bias),
    # computed in plain XLA and passed as a (B_pad, N) input.
    w_attn_x = attn_w[0, 2 * H:].astype(jnp.float32)              # (Tm1,)
    scores_x = (jnp.einsum('btn,t->bn', X_p, w_attn_x)
                + attn_b[0].astype(jnp.float32))                  # (B_pad, N)

    # Lane-flattened X so each timestep is a static lane slice inside the kernel.
    X_flat = X_p.reshape(B_pad, Tm1 * N)

    # Lane-dense output widths (multiples of 128 -> unmasked vst).
    XT_W = _round_up(Tm1 * N, _LANE)
    XE_W = _round_up(Tm1 * H, _LANE)

    xt_flat, xe_flat = pl.pallas_call(
        encoder_kernel,
        out_shape=(jax.ShapeDtypeStruct((B_pad, XT_W), jnp.float32),
                   jax.ShapeDtypeStruct((B_pad, XE_W), jnp.float32)),
        grid=(B_pad // tb,),
        in_specs=[
            pl.BlockSpec((tb, Tm1 * N), lambda i: (i, 0)),            # X (lane-flattened)
            pl.BlockSpec((tb, N), lambda i: (i, 0)),                  # scores_x
            pl.BlockSpec((N, fourH), lambda i: (0, 0)),               # w_ih.T
            pl.BlockSpec((2 * H, fourH + _LANE), lambda i: (0, 0)),   # folded W'
            pl.BlockSpec((1, fourH), lambda i: (0, 0)),               # combined bias
        ],
        out_specs=(
            pl.BlockSpec((tb, XT_W), lambda i: (i, 0)),
            pl.BlockSpec((tb, XE_W), lambda i: (i, 0)),
        ),
        compiler_params=pltpu.CompilerParams(
            dimension_semantics=("parallel",)),
    )(X_flat, scores_x, w_ih_t, wp, b_comb)

    x_tilde = xt_flat[:B, :Tm1 * N].reshape(B, Tm1, N)
    x_encoded = xe_flat[:B, :Tm1 * H].reshape(B, Tm1, H)
    return x_tilde, x_encoded


def encoder_reference(X, w_ih, w_hh, b_ih, b_hh, attn_w, attn_b):
    """Pure-JAX replica of the PyTorch forward, for verification."""
    B, Tm1, N = X.shape
    H = w_hh.shape[1]
    h = jnp.zeros((B, H), jnp.float32)
    c = jnp.zeros((B, H), jnp.float32)
    xt_list, xe_list = [], []
    Xp = jnp.transpose(X, (0, 2, 1))  # (B, N, Tm1)
    for t in range(Tm1):
        hc = jnp.broadcast_to(h[:, None, :], (B, N, H))
        sc = jnp.broadcast_to(c[:, None, :], (B, N, H))
        cat = jnp.concatenate([hc, sc, Xp], axis=2).reshape(-1, 2 * H + Tm1)
        e = cat @ attn_w.T + attn_b                      # (B*N, 1)
        alpha = jax.nn.softmax(e.reshape(B, N), axis=1)
        x_tilde = alpha * X[:, t, :]
        gates = x_tilde @ w_ih.T + b_ih + h @ w_hh.T + b_hh
        i_g = jax.nn.sigmoid(gates[:, :H])
        f_g = jax.nn.sigmoid(gates[:, H:2 * H])
        g_g = jnp.tanh(gates[:, 2 * H:3 * H])
        o_g = jax.nn.sigmoid(gates[:, 3 * H:])
        c = f_g * c + i_g * g_g
        h = o_g * jnp.tanh(c)
        xt_list.append(x_tilde)
        xe_list.append(h)
    return jnp.stack(xt_list, axis=1), jnp.stack(xe_list, axis=1)


if __name__ == "__main__":
    # Small shapes consistent with the module: T=9 => T-1=8 steps,
    # input_size=8 driving series, encoder_num_hidden=32, batch=2.
    B, T, N, H = 2, 9, 8, 32
    Tm1 = T - 1

    key = jax.random.PRNGKey(0)
    kx, k1, k2, k3, k4, k5, k6 = jax.random.split(key, 7)

    X = jax.random.normal(kx, (B, Tm1, N), dtype=jnp.float32)

    # Deterministic parameter init (uniform, PyTorch-like ranges).
    klstm = 1.0 / math.sqrt(H)
    w_ih = jax.random.uniform(k1, (4 * H, N), jnp.float32, -klstm, klstm)
    w_hh = jax.random.uniform(k2, (4 * H, H), jnp.float32, -klstm, klstm)
    b_ih = jax.random.uniform(k3, (4 * H,), jnp.float32, -klstm, klstm)
    b_hh = jax.random.uniform(k4, (4 * H,), jnp.float32, -klstm, klstm)

    kattn = 1.0 / math.sqrt(2 * H + Tm1)
    attn_w = jax.random.uniform(k5, (1, 2 * H + Tm1), jnp.float32, -kattn, kattn)
    attn_b = jax.random.uniform(k6, (1,), jnp.float32, -kattn, kattn)

    x_tilde, x_encoded = encoder_pallas(X, w_ih, w_hh, b_ih, b_hh, attn_w, attn_b)
    jax.block_until_ready((x_tilde, x_encoded))

    # Verify against the pure-JAX reference.
    xt_ref, xe_ref = encoder_reference(X, w_ih, w_hh, b_ih, b_hh, attn_w, attn_b)
    assert x_tilde.shape == (B, Tm1, N) and x_encoded.shape == (B, Tm1, H)
    assert jnp.allclose(x_tilde, xt_ref, atol=1e-3, rtol=1e-3)
    assert jnp.allclose(x_encoded, xe_ref, atol=1e-3, rtol=1e-3)

    print("KERNEL_OK")
</pallas_src>

<mosaic_0001>
module attributes {stable_mosaic.version = 11 : i64} {
  func.func @encoder_kernel(%arg0: i32, %arg1: memref<8x64xf32, #tpu.memory_space<vmem>>, %arg2: memref<8x8xf32, #tpu.memory_space<vmem>>, %arg3: memref<8x128xf32, #tpu.memory_space<vmem>>, %arg4: memref<64x256xf32, #tpu.memory_space<vmem>>, %arg5: memref<1x128xf32, #tpu.memory_space<vmem>>, %arg6: memref<8x128xf32, #tpu.memory_space<vmem>>, %arg7: memref<8x256xf32, #tpu.memory_space<vmem>>) attributes {dimension_semantics = [#tpu.dimension_semantics<parallel>], iteration_bounds = array<i64: 1>, scalar_prefetch = 0 : i64, scratch_operands = 0 : i64, tpu.core_type = #tpu.core_type<tc>, window_params = [{transform_indices = @transform_0, window_bounds = array<i64: 8, 64>}, {transform_indices = @transform_1, window_bounds = array<i64: 8, 8>}, {pipeline_mode = #tpu.pipeline_mode<synchronous>, transform_indices = @transform_2, window_bounds = array<i64: 8, 128>}, {pipeline_mode = #tpu.pipeline_mode<synchronous>, transform_indices = @transform_3, window_bounds = array<i64: 64, 256>}, {pipeline_mode = #tpu.pipeline_mode<synchronous>, transform_indices = @transform_4, window_bounds = array<i64: 1, 128>}, {transform_indices = @transform_5, window_bounds = array<i64: 8, 128>}, {transform_indices = @transform_6, window_bounds = array<i64: 8, 256>}]} {
    %c0 = arith.constant 0 : index
    %c0_0 = arith.constant 0 : index
    %0 = vector.load %arg1[%c0, %c0_0] : memref<8x64xf32, #tpu.memory_space<vmem>>, vector<8x64xf32>
    %c0_1 = arith.constant 0 : index
    %c0_2 = arith.constant 0 : index
    %1 = vector.load %arg2[%c0_1, %c0_2] : memref<8x8xf32, #tpu.memory_space<vmem>>, vector<8x8xf32>
    %c0_3 = arith.constant 0 : index
    %c0_4 = arith.constant 0 : index
    %2 = vector.load %arg3[%c0_3, %c0_4] : memref<8x128xf32, #tpu.memory_space<vmem>>, vector<8x128xf32>
    %c0_5 = arith.constant 0 : index
    %c0_6 = arith.constant 0 : index
    %3 = vector.load %arg4[%c0_5, %c0_6] : memref<64x256xf32, #tpu.memory_space<vmem>>, vector<64x256xf32>
    %c0_7 = arith.constant 0 : index
    %c0_8 = arith.constant 0 : index
    %4 = vector.load %arg5[%c0_7, %c0_8] : memref<1x128xf32, #tpu.memory_space<vmem>>, vector<1x128xf32>
    %5 = vector.shape_cast %4 : vector<1x128xf32> to vector<1x128xf32>
    %6 = vector.broadcast %5 : vector<1x128xf32> to vector<8x128xf32>
    %cst = arith.constant 0.000000e+00 : f32
    %7 = vector.broadcast %cst : f32 to vector<8x32xf32>
    %cst_9 = arith.constant 0.000000e+00 : f32
    %8 = vector.broadcast %cst_9 : f32 to vector<8x32xf32>
    %9 = tpu.concatenate %7, %8 in 1 : vector<8x32xf32>, vector<8x32xf32> -> vector<8x64xf32>
    %cst_10 = arith.constant dense<0.000000e+00> : vector<8x256xf32>
    %10 = tpu.matmul %9, %3, %cst_10 {dimension_numbers = #tpu.dot_dimension_numbers<[1], [0], [0], [1], [0, 0, 1, 1], [], []>} : vector<8x64xf32>, vector<64x256xf32>, vector<8x256xf32> -> vector<8x256xf32>
    %11 = vector.extract_strided_slice %10 {offsets = [0, 0], sizes = [8, 128], strides = [1, 1]} : vector<8x256xf32> to vector<8x128xf32>
    %12 = vector.extract_strided_slice %10 {offsets = [0, 128], sizes = [8, 8], strides = [1, 1]} : vector<8x256xf32> to vector<8x8xf32>
    %13 = arith.addf %1, %12 : vector<8x8xf32>
    %cst_11 = arith.constant dense<0xFF800000> : vector<8xf32>
    %14 = vector.multi_reduction <maximumf>, %13, %cst_11 [1] : vector<8x8xf32> to vector<8xf32>
    %15 = vector.shape_cast %14 : vector<8xf32> to vector<8x1xf32>
    %16 = vector.broadcast %15 : vector<8x1xf32> to vector<8x8xf32>
    %17 = arith.subf %13, %16 : vector<8x8xf32>
    %18 = math.exp %17 : vector<8x8xf32>
    %cst_12 = arith.constant dense<0.000000e+00> : vector<8xf32>
    %19 = vector.multi_reduction <add>, %18, %cst_12 [1] : vector<8x8xf32> to vector<8xf32>
    %20 = vector.shape_cast %19 : vector<8xf32> to vector<8x1xf32>
    %21 = tpu.reciprocal %20 {approx = true} : vector<8x1xf32> -> vector<8x1xf32>
    %22 = vector.broadcast %21 : vector<8x1xf32> to vector<8x8xf32>
    %23 = arith.mulf %18, %22 : vector<8x8xf32>
    %24 = vector.extract_strided_slice %0 {offsets = [0, 0], sizes = [8, 8], strides = [1, 1]} : vector<8x64xf32> to vector<8x8xf32>
    %25 = arith.mulf %23, %24 : vector<8x8xf32>
    %cst_13 = arith.constant dense<0.000000e+00> : vector<8x128xf32>
    %26 = tpu.matmul %25, %2, %cst_13 {dimension_numbers = #tpu.dot_dimension_numbers<[1], [0], [0], [1], [0, 0, 1, 1], [], []>} : vector<8x8xf32>, vector<8x128xf32>, vector<8x128xf32> -> vector<8x128xf32>
    %27 = arith.addf %26, %11 : vector<8x128xf32>
    %28 = arith.addf %27, %6 : vector<8x128xf32>
    %29 = arith.negf %28 : vector<8x128xf32>
    %30 = math.exp %29 : vector<8x128xf32>
    %cst_14 = arith.constant 1.000000e+00 : f32
    %31 = vector.broadcast %cst_14 : f32 to vector<8x128xf32>
    %32 = arith.addf %31, %30 : vector<8x128xf32>
    %33 = arith.divf %31, %32 : vector<8x128xf32>
    %34 = vector.extract_strided_slice %33 {offsets = [0, 0], sizes = [8, 32], strides = [1, 1]} : vector<8x128xf32> to vector<8x32xf32>
    %35 = vector.extract_strided_slice %33 {offsets = [0, 32], sizes = [8, 32], strides = [1, 1]} : vector<8x128xf32> to vector<8x32xf32>
    %36 = vector.extract_strided_slice %33 {offsets = [0, 96], sizes = [8, 32], strides = [1, 1]} : vector<8x128xf32> to vector<8x32xf32>
    %37 = vector.extract_strided_slice %28 {offsets = [0, 64], sizes = [8, 32], strides = [1, 1]} : vector<8x128xf32> to vector<8x32xf32>
    %38 = math.tanh %37 : vector<8x32xf32>
    %39 = arith.mulf %35, %8 : vector<8x32xf32>
    %40 = arith.mulf %34, %38 : vector<8x32xf32>
    %41 = arith.addf %39, %40 : vector<8x32xf32>
    %42 = math.tanh %41 : vector<8x32xf32>
    %43 = arith.mulf %36, %42 : vector<8x32xf32>
    %44 = tpu.concatenate %43, %41 in 1 : vector<8x32xf32>, vector<8x32xf32> -> vector<8x64xf32>
    %cst_15 = arith.constant dense<0.000000e+00> : vector<8x256xf32>
    %45 = tpu.matmul %44, %3, %cst_15 {dimension_numbers = #tpu.dot_dimension_numbers<[1], [0], [0], [1], [0, 0, 1, 1], [], []>} : vector<8x64xf32>, vector<64x256xf32>, vector<8x256xf32> -> vector<8x256xf32>
    %46 = vector.extract_strided_slice %45 {offsets = [0, 0], sizes = [8, 128], strides = [1, 1]} : vector<8x256xf32> to vector<8x128xf32>
    %47 = vector.extract_strided_slice %45 {offsets = [0, 128], sizes = [8, 8], strides = [1, 1]} : vector<8x256xf32> to vector<8x8xf32>
    %48 = arith.addf %1, %47 : vector<8x8xf32>
    %cst_16 = arith.constant dense<0xFF800000> : vector<8xf32>
    %49 = vector.multi_reduction <maximumf>, %48, %cst_16 [1] : vector<8x8xf32> to vector<8xf32>
    %50 = vector.shape_cast %49 : vector<8xf32> to vector<8x1xf32>
    %51 = vector.broadcast %50 : vector<8x1xf32> to vector<8x8xf32>
    %52 = arith.subf %48, %51 : vector<8x8xf32>
    %53 = math.exp %52 : vector<8x8xf32>
    %cst_17 = arith.constant dense<0.000000e+00> : vector<8xf32>
    %54 = vector.multi_reduction <add>, %53, %cst_17 [1] : vector<8x8xf32> to vector<8xf32>
    %55 = vector.shape_cast %54 : vector<8xf32> to vector<8x1xf32>
    %56 = tpu.reciprocal %55 {approx = true} : vector<8x1xf32> -> vector<8x1xf32>
    %57 = vector.broadcast %56 : vector<8x1xf32> to vector<8x8xf32>
    %58 = arith.mulf %53, %57 : vector<8x8xf32>
    %59 = vector.extract_strided_slice %0 {offsets = [0, 8], sizes = [8, 8], strides = [1, 1]} : vector<8x64xf32> to vector<8x8xf32>
    %60 = arith.mulf %58, %59 : vector<8x8xf32>
    %cst_18 = arith.constant dense<0.000000e+00> : vector<8x128xf32>
    %61 = tpu.matmul %60, %2, %cst_18 {dimension_numbers = #tpu.dot_dimension_numbers<[1], [0], [0], [1], [0, 0, 1, 1], [], []>} : vector<8x8xf32>, vector<8x128xf32>, vector<8x128xf32> -> vector<8x128xf32>
    %62 = arith.addf %61, %46 : vector<8x128xf32>
    %63 = arith.addf %62, %6 : vector<8x128xf32>
    %64 = arith.negf %63 : vector<8x128xf32>
    %65 = math.exp %64 : vector<8x128xf32>
    %cst_19 = arith.constant 1.000000e+00 : f32
    %66 = vector.broadcast %cst_19 : f32 to vector<8x128xf32>
    %67 = arith.addf %66, %65 : vector<8x128xf32>
    %68 = arith.divf %66, %67 : vector<8x128xf32>
    %69 = vector.extract_strided_slice %68 {offsets = [0, 0], sizes = [8, 32], strides = [1, 1]} : vector<8x128xf32> to vector<8x32xf32>
    %70 = vector.extract_strided_slice %68 {offsets = [0, 32], sizes = [8, 32], strides = [1, 1]} : vector<8x128xf32> to vector<8x32xf32>
    %71 = vector.extract_strided_slice %68 {offsets = [0, 96], sizes = [8, 32], strides = [1, 1]} : vector<8x128xf32> to vector<8x32xf32>
    %72 = vector.extract_strided_slice %63 {offsets = [0, 64], sizes = [8, 32], strides = [1, 1]} : vector<8x128xf32> to vector<8x32xf32>
    %73 = math.tanh %72 : vector<8x32xf32>
    %74 = arith.mulf %70, %41 : vector<8x32xf32>
    %75 = arith.mulf %69, %73 : vector<8x32xf32>
    %76 = arith.addf %74, %75 : vector<8x32xf32>
    %77 = math.tanh %76 : vector<8x32xf32>
    %78 = arith.mulf %71, %77 : vector<8x32xf32>
    %79 = tpu.concatenate %78, %76 in 1 : vector<8x32xf32>, vector<8x32xf32> -> vector<8x64xf32>
    %cst_20 = arith.constant dense<0.000000e+00> : vector<8x256xf32>
    %80 = tpu.matmul %79, %3, %cst_20 {dimension_numbers = #tpu.dot_dimension_numbers<[1], [0], [0], [1], [0, 0, 1, 1], [], []>} : vector<8x64xf32>, vector<64x256xf32>, vector<8x256xf32> -> vector<8x256xf32>
    %81 = vector.extract_strided_slice %80 {offsets = [0, 0], sizes = [8, 128], strides = [1, 1]} : vector<8x256xf32> to vector<8x128xf32>
    %82 = vector.extract_strided_slice %80 {offsets = [0, 128], sizes = [8, 8], strides = [1, 1]} : vector<8x256xf32> to vector<8x8xf32>
    %83 = arith.addf %1, %82 : vector<8x8xf32>
    %cst_21 = arith.constant dense<0xFF800000> : vector<8xf32>
    %84 = vector.multi_reduction <maximumf>, %83, %cst_21 [1] : vector<8x8xf32> to vector<8xf32>
    %85 = vector.shape_cast %84 : vector<8xf32> to vector<8x1xf32>
    %86 = vector.broadcast %85 : vector<8x1xf32> to vector<8x8xf32>
    %87 = arith.subf %83, %86 : vector<8x8xf32>
    %88 = math.exp %87 : vector<8x8xf32>
    %cst_22 = arith.constant dense<0.000000e+00> : vector<8xf32>
    %89 = vector.multi_reduction <add>, %88, %cst_22 [1] : vector<8x8xf32> to vector<8xf32>
    %90 = vector.shape_cast %89 : vector<8xf32> to vector<8x1xf32>
    %91 = tpu.reciprocal %90 {approx = true} : vector<8x1xf32> -> vector<8x1xf32>
    %92 = vector.broadcast %91 : vector<8x1xf32> to vector<8x8xf32>
    %93 = arith.mulf %88, %92 : vector<8x8xf32>
    %94 = vector.extract_strided_slice %0 {offsets = [0, 16], sizes = [8, 8], strides = [1, 1]} : vector<8x64xf32> to vector<8x8xf32>
    %95 = arith.mulf %93, %94 : vector<8x8xf32>
    %cst_23 = arith.constant dense<0.000000e+00> : vector<8x128xf32>
    %96 = tpu.matmul %95, %2, %cst_23 {dimension_numbers = #tpu.dot_dimension_numbers<[1], [0], [0], [1], [0, 0, 1, 1], [], []>} : vector<8x8xf32>, vector<8x128xf32>, vector<8x128xf32> -> vector<8x128xf32>
    %97 = arith.addf %96, %81 : vector<8x128xf32>
    %98 = arith.addf %97, %6 : vector<8x128xf32>
    %99 = arith.negf %98 : vector<8x128xf32>
    %100 = math.exp %99 : vector<8x128xf32>
    %cst_24 = arith.constant 1.000000e+00 : f32
    %101 = vector.broadcast %cst_24 : f32 to vector<8x128xf32>
    %102 = arith.addf %101, %100 : vector<8x128xf32>
    %103 = arith.divf %101, %102 : vector<8x128xf32>
    %104 = vector.extract_strided_slice %103 {offsets = [0, 0], sizes = [8, 32], strides = [1, 1]} : vector<8x128xf32> to vector<8x32xf32>
    %105 = vector.extract_strided_slice %103 {offsets = [0, 32], sizes = [8, 32], strides = [1, 1]} : vector<8x128xf32> to vector<8x32xf32>
    %106 = vector.extract_strided_slice %103 {offsets = [0, 96], sizes = [8, 32], strides = [1, 1]} : vector<8x128xf32> to vector<8x32xf32>
    %107 = vector.extract_strided_slice %98 {offsets = [0, 64], sizes = [8, 32], strides = [1, 1]} : vector<8x128xf32> to vector<8x32xf32>
    %108 = math.tanh %107 : vector<8x32xf32>
    %109 = arith.mulf %105, %76 : vector<8x32xf32>
    %110 = arith.mulf %104, %108 : vector<8x32xf32>
    %111 = arith.addf %109, %110 : vector<8x32xf32>
    %112 = math.tanh %111 : vector<8x32xf32>
    %113 = arith.mulf %106, %112 : vector<8x32xf32>
    %114 = tpu.concatenate %113, %111 in 1 : vector<8x32xf32>, vector<8x32xf32> -> vector<8x64xf32>
    %cst_25 = arith.constant dense<0.000000e+00> : vector<8x256xf32>
    %115 = tpu.matmul %114, %3, %cst_25 {dimension_numbers = #tpu.dot_dimension_numbers<[1], [0], [0], [1], [0, 0, 1, 1], [], []>} : vector<8x64xf32>, vector<64x256xf32>, vector<8x256xf32> -> vector<8x256xf32>
    %116 = vector.extract_strided_slice %115 {offsets = [0, 0], sizes = [8, 128], strides = [1, 1]} : vector<8x256xf32> to vector<8x128xf32>
    %117 = vector.extract_strided_slice %115 {offsets = [0, 128], sizes = [8, 8], strides = [1, 1]} : vector<8x256xf32> to vector<8x8xf32>
    %118 = arith.addf %1, %117 : vector<8x8xf32>
    %cst_26 = arith.constant dense<0xFF800000> : vector<8xf32>
    %119 = vector.multi_reduction <maximumf>, %118, %cst_26 [1] : vector<8x8xf32> to vector<8xf32>
    %120 = vector.shape_cast %119 : vector<8xf32> to vector<8x1xf32>
    %121 = vector.broadcast %120 : vector<8x1xf32> to vector<8x8xf32>
    %122 = arith.subf %118, %121 : vector<8x8xf32>
    %123 = math.exp %122 : vector<8x8xf32>
    %cst_27 = arith.constant dense<0.000000e+00> : vector<8xf32>
    %124 = vector.multi_reduction <add>, %123, %cst_27 [1] : vector<8x8xf32> to vector<8xf32>
    %125 = vector.shape_cast %124 : vector<8xf32> to vector<8x1xf32>
    %126 = tpu.reciprocal %125 {approx = true} : vector<8x1xf32> -> vector<8x1xf32>
    %127 = vector.broadcast %126 : vector<8x1xf32> to vector<8x8xf32>
    %128 = arith.mulf %123, %127 : vector<8x8xf32>
    %129 = vector.extract_strided_slice %0 {offsets = [0, 24], sizes = [8, 8], strides = [1, 1]} : vector<8x64xf32> to vector<8x8xf32>
    %130 = arith.mulf %128, %129 : vector<8x8xf32>
    %cst_28 = arith.constant dense<0.000000e+00> : vector<8x128xf32>
    %131 = tpu.matmul %130, %2, %cst_28 {dimension_numbers = #tpu.dot_dimension_numbers<[1], [0], [0], [1], [0, 0, 1, 1], [], []>} : vector<8x8xf32>, vector<8x128xf32>, vector<8x128xf32> -> vector<8x128xf32>
    %132 = arith.addf %131, %116 : vector<8x128xf32>
    %133 = arith.addf %132, %6 : vector<8x128xf32>
    %134 = arith.negf %133 : vector<8x128xf32>
    %135 = math.exp %134 : vector<8x128xf32>
    %cst_29 = arith.constant 1.000000e+00 : f32
    %136 = vector.broadcast %cst_29 : f32 to vector<8x128xf32>
    %137 = arith.addf %136, %135 : vector<8x128xf32>
    %138 = arith.divf %136, %137 : vector<8x128xf32>
    %139 = vector.extract_strided_slice %138 {offsets = [0, 0], sizes = [8, 32], strides = [1, 1]} : vector<8x128xf32> to vector<8x32xf32>
    %140 = vector.extract_strided_slice %138 {offsets = [0, 32], sizes = [8, 32], strides = [1, 1]} : vector<8x128xf32> to vector<8x32xf32>
    %141 = vector.extract_strided_slice %138 {offsets = [0, 96], sizes = [8, 32], strides = [1, 1]} : vector<8x128xf32> to vector<8x32xf32>
    %142 = vector.extract_strided_slice %133 {offsets = [0, 64], sizes = [8, 32], strides = [1, 1]} : vector<8x128xf32> to vector<8x32xf32>
    %143 = math.tanh %142 : vector<8x32xf32>
    %144 = arith.mulf %140, %111 : vector<8x32xf32>
    %145 = arith.mulf %139, %143 : vector<8x32xf32>
    %146 = arith.addf %144, %145 : vector<8x32xf32>
    %147 = math.tanh %146 : vector<8x32xf32>
    %148 = arith.mulf %141, %147 : vector<8x32xf32>
    %149 = tpu.concatenate %148, %146 in 1 : vector<8x32xf32>, vector<8x32xf32> -> vector<8x64xf32>
    %cst_30 = arith.constant dense<0.000000e+00> : vector<8x256xf32>
    %150 = tpu.matmul %149, %3, %cst_30 {dimension_numbers = #tpu.dot_dimension_numbers<[1], [0], [0], [1], [0, 0, 1, 1], [], []>} : vector<8x64xf32>, vector<64x256xf32>, vector<8x256xf32> -> vector<8x256xf32>
    %151 = vector.extract_strided_slice %150 {offsets = [0, 0], sizes = [8, 128], strides = [1, 1]} : vector<8x256xf32> to vector<8x128xf32>
    %152 = vector.extract_strided_slice %150 {offsets = [0, 128], sizes = [8, 8], strides = [1, 1]} : vector<8x256xf32> to vector<8x8xf32>
    %153 = arith.addf %1, %152 : vector<8x8xf32>
    %cst_31 = arith.constant dense<0xFF800000> : vector<8xf32>
    %154 = vector.multi_reduction <maximumf>, %153, %cst_31 [1] : vector<8x8xf32> to vector<8xf32>
    %155 = vector.shape_cast %154 : vector<8xf32> to vector<8x1xf32>
    %156 = vector.broadcast %155 : vector<8x1xf32> to vector<8x8xf32>
    %157 = arith.subf %153, %156 : vector<8x8xf32>
    %158 = math.exp %157 : vector<8x8xf32>
    %cst_32 = arith.constant dense<0.000000e+00> : vector<8xf32>
    %159 = vector.multi_reduction <add>, %158, %cst_32 [1] : vector<8x8xf32> to vector<8xf32>
    %160 = vector.shape_cast %159 : vector<8xf32> to vector<8x1xf32>
    %161 = tpu.reciprocal %160 {approx = true} : vector<8x1xf32> -> vector<8x1xf32>
    %162 = vector.broadcast %161 : vector<8x1xf32> to vector<8x8xf32>
    %163 = arith.mulf %158, %162 : vector<8x8xf32>
    %164 = vector.extract_strided_slice %0 {offsets = [0, 32], sizes = [8, 8], strides = [1, 1]} : vector<8x64xf32> to vector<8x8xf32>
    %165 = arith.mulf %163, %164 : vector<8x8xf32>
    %cst_33 = arith.constant dense<0.000000e+00> : vector<8x128xf32>
    %166 = tpu.matmul %165, %2, %cst_33 {dimension_numbers = #tpu.dot_dimension_numbers<[1], [0], [0], [1], [0, 0, 1, 1], [], []>} : vector<8x8xf32>, vector<8x128xf32>, vector<8x128xf32> -> vector<8x128xf32>
    %167 = arith.addf %166, %151 : vector<8x128xf32>
    %168 = arith.addf %167, %6 : vector<8x128xf32>
    %169 = arith.negf %168 : vector<8x128xf32>
    %170 = math.exp %169 : vector<8x128xf32>
    %cst_34 = arith.constant 1.000000e+00 : f32
    %171 = vector.broadcast %cst_34 : f32 to vector<8x128xf32>
    %172 = arith.addf %171, %170 : vector<8x128xf32>
    %173 = arith.divf %171, %172 : vector<8x128xf32>
    %174 = vector.extract_strided_slice %173 {offsets = [0, 0], sizes = [8, 32], strides = [1, 1]} : vector<8x128xf32> to vector<8x32xf32>
    %175 = vector.extract_strided_slice %173 {offsets = [0, 32], sizes = [8, 32], strides = [1, 1]} : vector<8x128xf32> to vector<8x32xf32>
    %176 = vector.extract_strided_slice %173 {offsets = [0, 96], sizes = [8, 32], strides = [1, 1]} : vector<8x128xf32> to vector<8x32xf32>
    %177 = vector.extract_strided_slice %168 {offsets = [0, 64], sizes = [8, 32], strides = [1, 1]} : vector<8x128xf32> to vector<8x32xf32>
    %178 = math.tanh %177 : vector<8x32xf32>
    %179 = arith.mulf %175, %146 : vector<8x32xf32>
    %180 = arith.mulf %174, %178 : vector<8x32xf32>
    %181 = arith.addf %179, %180 : vector<8x32xf32>
    %182 = math.tanh %181 : vector<8x32xf32>
    %183 = arith.mulf %176, %182 : vector<8x32xf32>
    %184 = tpu.concatenate %183, %181 in 1 : vector<8x32xf32>, vector<8x32xf32> -> vector<8x64xf32>
    %cst_35 = arith.constant dense<0.000000e+00> : vector<8x256xf32>
    %185 = tpu.matmul %184, %3, %cst_35 {dimension_numbers = #tpu.dot_dimension_numbers<[1], [0], [0], [1], [0, 0, 1, 1], [], []>} : vector<8x64xf32>, vector<64x256xf32>, vector<8x256xf32> -> vector<8x256xf32>
    %186 = vector.extract_strided_slice %185 {offsets = [0, 0], sizes = [8, 128], strides = [1, 1]} : vector<8x256xf32> to vector<8x128xf32>
    %187 = vector.extract_strided_slice %185 {offsets = [0, 128], sizes = [8, 8], strides = [1, 1]} : vector<8x256xf32> to vector<8x8xf32>
    %188 = arith.addf %1, %187 : vector<8x8xf32>
    %cst_36 = arith.constant dense<0xFF800000> : vector<8xf32>
    %189 = vector.multi_reduction <maximumf>, %188, %cst_36 [1] : vector<8x8xf32> to vector<8xf32>
    %190 = vector.shape_cast %189 : vector<8xf32> to vector<8x1xf32>
    %191 = vector.broadcast %190 : vector<8x1xf32> to vector<8x8xf32>
    %192 = arith.subf %188, %191 : vector<8x8xf32>
    %193 = math.exp %192 : vector<8x8xf32>
    %cst_37 = arith.constant dense<0.000000e+00> : vector<8xf32>
    %194 = vector.multi_reduction <add>, %193, %cst_37 [1] : vector<8x8xf32> to vector<8xf32>
    %195 = vector.shape_cast %194 : vector<8xf32> to vector<8x1xf32>
    %196 = tpu.reciprocal %195 {approx = true} : vector<8x1xf32> -> vector<8x1xf32>
    %197 = vector.broadcast %196 : vector<8x1xf32> to vector<8x8xf32>
    %198 = arith.mulf %193, %197 : vector<8x8xf32>
    %199 = vector.extract_strided_slice %0 {offsets = [0, 40], sizes = [8, 8], strides = [1, 1]} : vector<8x64xf32> to vector<8x8xf32>
    %200 = arith.mulf %198, %199 : vector<8x8xf32>
    %cst_38 = arith.constant dense<0.000000e+00> : vector<8x128xf32>
    %201 = tpu.matmul %200, %2, %cst_38 {dimension_numbers = #tpu.dot_dimension_numbers<[1], [0], [0], [1], [0, 0, 1, 1], [], []>} : vector<8x8xf32>, vector<8x128xf32>, vector<8x128xf32> -> vector<8x128xf32>
    %202 = arith.addf %201, %186 : vector<8x128xf32>
    %203 = arith.addf %202, %6 : vector<8x128xf32>
    %204 = arith.negf %203 : vector<8x128xf32>
    %205 = math.exp %204 : vector<8x128xf32>
    %cst_39 = arith.constant 1.000000e+00 : f32
    %206 = vector.broadcast %cst_39 : f32 to vector<8x128xf32>
    %207 = arith.addf %206, %205 : vector<8x128xf32>
    %208 = arith.divf %206, %207 : vector<8x128xf32>
    %209 = vector.extract_strided_slice %208 {offsets = [0, 0], sizes = [8, 32], strides = [1, 1]} : vector<8x128xf32> to vector<8x32xf32>
    %210 = vector.extract_strided_slice %208 {offsets = [0, 32], sizes = [8, 32], strides = [1, 1]} : vector<8x128xf32> to vector<8x32xf32>
    %211 = vector.extract_strided_slice %208 {offsets = [0, 96], sizes = [8, 32], strides = [1, 1]} : vector<8x128xf32> to vector<8x32xf32>
    %212 = vector.extract_strided_slice %203 {offsets = [0, 64], sizes = [8, 32], strides = [1, 1]} : vector<8x128xf32> to vector<8x32xf32>
    %213 = math.tanh %212 : vector<8x32xf32>
    %214 = arith.mulf %210, %181 : vector<8x32xf32>
    %215 = arith.mulf %209, %213 : vector<8x32xf32>
    %216 = arith.addf %214, %215 : vector<8x32xf32>
    %217 = math.tanh %216 : vector<8x32xf32>
    %218 = arith.mulf %211, %217 : vector<8x32xf32>
    %219 = tpu.concatenate %218, %216 in 1 : vector<8x32xf32>, vector<8x32xf32> -> vector<8x64xf32>
    %cst_40 = arith.constant dense<0.000000e+00> : vector<8x256xf32>
    %220 = tpu.matmul %219, %3, %cst_40 {dimension_numbers = #tpu.dot_dimension_numbers<[1], [0], [0], [1], [0, 0, 1, 1], [], []>} : vector<8x64xf32>, vector<64x256xf32>, vector<8x256xf32> -> vector<8x256xf32>
    %221 = vector.extract_strided_slice %220 {offsets = [0, 0], sizes = [8, 128], strides = [1, 1]} : vector<8x256xf32> to vector<8x128xf32>
    %222 = vector.extract_strided_slice %220 {offsets = [0, 128], sizes = [8, 8], strides = [1, 1]} : vector<8x256xf32> to vector<8x8xf32>
    %223 = arith.addf %1, %222 : vector<8x8xf32>
    %cst_41 = arith.constant dense<0xFF800000> : vector<8xf32>
    %224 = vector.multi_reduction <maximumf>, %223, %cst_41 [1] : vector<8x8xf32> to vector<8xf32>
    %225 = vector.shape_cast %224 : vector<8xf32> to vector<8x1xf32>
    %226 = vector.broadcast %225 : vector<8x1xf32> to vector<8x8xf32>
    %227 = arith.subf %223, %226 : vector<8x8xf32>
    %228 = math.exp %227 : vector<8x8xf32>
    %cst_42 = arith.constant dense<0.000000e+00> : vector<8xf32>
    %229 = vector.multi_reduction <add>, %228, %cst_42 [1] : vector<8x8xf32> to vector<8xf32>
    %230 = vector.shape_cast %229 : vector<8xf32> to vector<8x1xf32>
    %231 = tpu.reciprocal %230 {approx = true} : vector<8x1xf32> -> vector<8x1xf32>
    %232 = vector.broadcast %231 : vector<8x1xf32> to vector<8x8xf32>
    %233 = arith.mulf %228, %232 : vector<8x8xf32>
    %234 = vector.extract_strided_slice %0 {offsets = [0, 48], sizes = [8, 8], strides = [1, 1]} : vector<8x64xf32> to vector<8x8xf32>
    %235 = arith.mulf %233, %234 : vector<8x8xf32>
    %cst_43 = arith.constant dense<0.000000e+00> : vector<8x128xf32>
    %236 = tpu.matmul %235, %2, %cst_43 {dimension_numbers = #tpu.dot_dimension_numbers<[1], [0], [0], [1], [0, 0, 1, 1], [], []>} : vector<8x8xf32>, vector<8x128xf32>, vector<8x128xf32> -> vector<8x128xf32>
    %237 = arith.addf %236, %221 : vector<8x128xf32>
    %238 = arith.addf %237, %6 : vector<8x128xf32>
    %239 = arith.negf %238 : vector<8x128xf32>
    %240 = math.exp %239 : vector<8x128xf32>
    %cst_44 = arith.constant 1.000000e+00 : f32
    %241 = vector.broadcast %cst_44 : f32 to vector<8x128xf32>
    %242 = arith.addf %241, %240 : vector<8x128xf32>
    %243 = arith.divf %241, %242 : vector<8x128xf32>
    %244 = vector.extract_strided_slice %243 {offsets = [0, 0], sizes = [8, 32], strides = [1, 1]} : vector<8x128xf32> to vector<8x32xf32>
    %245 = vector.extract_strided_slice %243 {offsets = [0, 32], sizes = [8, 32], strides = [1, 1]} : vector<8x128xf32> to vector<8x32xf32>
    %246 = vector.extract_strided_slice %243 {offsets = [0, 96], sizes = [8, 32], strides = [1, 1]} : vector<8x128xf32> to vector<8x32xf32>
    %247 = vector.extract_strided_slice %238 {offsets = [0, 64], sizes = [8, 32], strides = [1, 1]} : vector<8x128xf32> to vector<8x32xf32>
    %248 = math.tanh %247 : vector<8x32xf32>
    %249 = arith.mulf %245, %216 : vector<8x32xf32>
    %250 = arith.mulf %244, %248 : vector<8x32xf32>
    %251 = arith.addf %249, %250 : vector<8x32xf32>
    %252 = math.tanh %251 : vector<8x32xf32>
    %253 = arith.mulf %246, %252 : vector<8x32xf32>
    %254 = tpu.concatenate %253, %251 in 1 : vector<8x32xf32>, vector<8x32xf32> -> vector<8x64xf32>
    %cst_45 = arith.constant dense<0.000000e+00> : vector<8x256xf32>
    %255 = tpu.matmul %254, %3, %cst_45 {dimension_numbers = #tpu.dot_dimension_numbers<[1], [0], [0], [1], [0, 0, 1, 1], [], []>} : vector<8x64xf32>, vector<64x256xf32>, vector<8x256xf32> -> vector<8x256xf32>
    %256 = vector.extract_strided_slice %255 {offsets = [0, 0], sizes = [8, 128], strides = [1, 1]} : vector<8x256xf32> to vector<8x128xf32>
    %257 = vector.extract_strided_slice %255 {offsets = [0, 128], sizes = [8, 8], strides = [1, 1]} : vector<8x256xf32> to vector<8x8xf32>
    %258 = arith.addf %1, %257 : vector<8x8xf32>
    %cst_46 = arith.constant dense<0xFF800000> : vector<8xf32>
    %259 = vector.multi_reduction <maximumf>, %258, %cst_46 [1] : vector<8x8xf32> to vector<8xf32>
    %260 = vector.shape_cast %259 : vector<8xf32> to vector<8x1xf32>
    %261 = vector.broadcast %260 : vector<8x1xf32> to vector<8x8xf32>
    %262 = arith.subf %258, %261 : vector<8x8xf32>
    %263 = math.exp %262 : vector<8x8xf32>
    %cst_47 = arith.constant dense<0.000000e+00> : vector<8xf32>
    %264 = vector.multi_reduction <add>, %263, %cst_47 [1] : vector<8x8xf32> to vector<8xf32>
    %265 = vector.shape_cast %264 : vector<8xf32> to vector<8x1xf32>
    %266 = tpu.reciprocal %265 {approx = true} : vector<8x1xf32> -> vector<8x1xf32>
    %267 = vector.broadcast %266 : vector<8x1xf32> to vector<8x8xf32>
    %268 = arith.mulf %263, %267 : vector<8x8xf32>
    %269 = vector.extract_strided_slice %0 {offsets = [0, 56], sizes = [8, 8], strides = [1, 1]} : vector<8x64xf32> to vector<8x8xf32>
    %270 = arith.mulf %268, %269 : vector<8x8xf32>
    %cst_48 = arith.constant dense<0.000000e+00> : vector<8x128xf32>
    %271 = tpu.matmul %270, %2, %cst_48 {dimension_numbers = #tpu.dot_dimension_numbers<[1], [0], [0], [1], [0, 0, 1, 1], [], []>} : vector<8x8xf32>, vector<8x128xf32>, vector<8x128xf32> -> vector<8x128xf32>
    %272 = arith.addf %271, %256 : vector<8x128xf32>
    %273 = arith.addf %272, %6 : vector<8x128xf32>
    %274 = arith.negf %273 : vector<8x128xf32>
    %275 = math.exp %274 : vector<8x128xf32>
    %cst_49 = arith.constant 1.000000e+00 : f32
    %276 = vector.broadcast %cst_49 : f32 to vector<8x128xf32>
    %277 = arith.addf %276, %275 : vector<8x128xf32>
    %278 = arith.divf %276, %277 : vector<8x128xf32>
    %279 = vector.extract_strided_slice %278 {offsets = [0, 0], sizes = [8, 32], strides = [1, 1]} : vector<8x128xf32> to vector<8x32xf32>
    %280 = vector.extract_strided_slice %278 {offsets = [0, 32], sizes = [8, 32], strides = [1, 1]} : vector<8x128xf32> to vector<8x32xf32>
    %281 = vector.extract_strided_slice %278 {offsets = [0, 96], sizes = [8, 32], strides = [1, 1]} : vector<8x128xf32> to vector<8x32xf32>
    %282 = vector.extract_strided_slice %273 {offsets = [0, 64], sizes = [8, 32], strides = [1, 1]} : vector<8x128xf32> to vector<8x32xf32>
    %283 = math.tanh %282 : vector<8x32xf32>
    %284 = arith.mulf %280, %251 : vector<8x32xf32>
    %285 = arith.mulf %279, %283 : vector<8x32xf32>
    %286 = arith.addf %284, %285 : vector<8x32xf32>
    %287 = math.tanh %286 : vector<8x32xf32>
    %288 = arith.mulf %281, %287 : vector<8x32xf32>
    %cst_50 = arith.constant 0.000000e+00 : f32
    %289 = vector.broadcast %cst_50 : f32 to vector<8x64xf32>
    %290 = tpu.concatenate %25, %60, %95, %130, %165, %200, %235, %270, %289 in 1 : vector<8x8xf32>, vector<8x8xf32>, vector<8x8xf32>, vector<8x8xf32>, vector<8x8xf32>, vector<8x8xf32>, vector<8x8xf32>, vector<8x8xf32>, vector<8x64xf32> -> vector<8x128xf32>
    %c0_51 = arith.constant 0 : index
    %c0_52 = arith.constant 0 : index
    %291 = vector.load %arg6[%c0_51, %c0_52] : memref<8x128xf32, #tpu.memory_space<vmem>>, vector<8x128xf32>
    tpu.vector_store %arg6[%c0_51, %c0_52], %290 {strides = array<i32>} : memref<8x128xf32, #tpu.memory_space<vmem>>, vector<8x128xf32>,
    %292 = tpu.concatenate %43, %78, %113, %148, %183, %218, %253, %288 in 1 : vector<8x32xf32>, vector<8x32xf32>, vector<8x32xf32>, vector<8x32xf32>, vector<8x32xf32>, vector<8x32xf32>, vector<8x32xf32>, vector<8x32xf32> -> vector<8x256xf32>
    %c0_53 = arith.constant 0 : index
    %c0_54 = arith.constant 0 : index
    %293 = vector.load %arg7[%c0_53, %c0_54] : memref<8x256xf32, #tpu.memory_space<vmem>>, vector<8x256xf32>
    tpu.vector_store %arg7[%c0_53, %c0_54], %292 {strides = array<i32>} : memref<8x256xf32, #tpu.memory_space<vmem>>, vector<8x256xf32>,
    return
  }
  func.func @transform_0(%arg0: i32) -> (i32, i32) {
    %c0_i32 = arith.constant 0 : i32
    %c0_i32_0 = arith.constant 0 : i32
    return %arg0, %c0_i32 : i32, i32
  }
  func.func @transform_1(%arg0: i32) -> (i32, i32) {
    %c0_i32 = arith.constant 0 : i32
    %c0_i32_0 = arith.constant 0 : i32
    return %arg0, %c0_i32 : i32, i32
  }
  func.func @transform_2(%arg0: i32) -> (i32, i32) {
    %c0_i32 = arith.constant 0 : i32
    %c0_i32_0 = arith.constant 0 : i32
    %c0_i32_1 = arith.constant 0 : i32
    return %c0_i32, %c0_i32_0 : i32, i32
  }
  func.func @transform_3(%arg0: i32) -> (i32, i32) {
    %c0_i32 = arith.constant 0 : i32
    %c0_i32_0 = arith.constant 0 : i32
    %c0_i32_1 = arith.constant 0 : i32
    return %c0_i32, %c0_i32_0 : i32, i32
  }
  func.func @transform_4(%arg0: i32) -> (i32, i32) {
    %c0_i32 = arith.constant 0 : i32
    %c0_i32_0 = arith.constant 0 : i32
    %c0_i32_1 = arith.constant 0 : i32
    return %c0_i32, %c0_i32_0 : i32, i32
  }
  func.func @transform_5(%arg0: i32) -> (i32, i32) {
    %c0_i32 = arith.constant 0 : i32
    %c0_i32_0 = arith.constant 0 : i32
    return %arg0, %c0_i32 : i32, i32
  }
  func.func @transform_6(%arg0: i32) -> (i32, i32) {
    %c0_i32 = arith.constant 0 : i32
    %c0_i32_0 = arith.constant 0 : i32
    return %arg0, %c0_i32 : i32, i32
  }
}

</mosaic_0001>

<bundles_post_ra>
// kernel: tpu_custom_call.1
= control target key start
LH: loop header
LB: loop body
LE: loop exit
PB: predicated region body
PF: predicated region fallthrough
CT: control target
= control target key end

     0   :  { %12 = vsyncpa [#allocation3], 0  ;;  %s1952_s0 = inlined_call_operand.hbm [shape: f32[8,64], index: 0, kind: input, shape index: {}]   ;;  %s1953_s1 = inlined_call_operand.hbm [shape: f32[8,8], index: 1, kind: input, shape index: {}]   ;;  %s1954_s2 = inlined_call_operand.hbm [shape: f32[8,128], index: 2, kind: input, shape index: {}]   ;;  %s1955_s3 = inlined_call_operand.hbm [shape: f32[64,256], index: 3, kind: input, shape index: {}]   ;;  %s1956_s4 = inlined_call_operand.vmem [shape: f32[1,128], index: 4, kind: input, shape index: {}]   ;;  %s1957_s5 = inlined_call_operand.hbm [shape: f32[8,128], index: 5, kind: output, shape index: {0}]   ;;  %s1958_s6 = inlined_call_operand.hbm [shape: f32[8,256], index: 6, kind: output, shape index: {1}]  }
   0x1   :  { %13 = vsyncpa [#allocation6], 0 }
   0x2   :  { %14 = vsyncpa [#allocation9], 0 }
   0x3   :  { %15 = vsyncpa [#allocation4], 0  ;;  %s33_s23 = sshll.u32 %s1953_s1, 4  ;;  %s34_s23 = int_to_ptr.hbm [resolvable:$true] %s33_s23 }
   0x4   :  { %16 = vsyncpa [#allocation12], 0  ;;  %s1498_s24 = smov [#allocation5]   ;;  %s22_s28 = sshll.u32 %s1952_s0, 4  ;;  %s23_s28 = int_to_ptr.hbm [resolvable:$true] %s22_s28 }
   0x5   :  { %s35_s25 = sshll.u32 %s1498_s24, 4  ;;  %s1499_s29 = smov [#allocation2]   ;;  %s36_s25 = int_to_ptr.vmem [resolvable:$true] %s35_s25 }
   0x6   :  { %38 = dma.hbm_to_vmem [thread:$0]  %s34_s23, 128, %s36_s25, [#allocation6]  }
   0x7   :  { %s24_s30 = sshll.u32 %s1499_s29, 4  ;;  %s44_s9 = sshll.u32 %s1954_s2, 4  ;;  %s25_s30 = int_to_ptr.vmem [resolvable:$true] %s24_s30  ;;  %s45_s9 = int_to_ptr.hbm [resolvable:$true] %s44_s9 }
   0x8   :  { %27 = dma.hbm_to_vmem [thread:$0]  %s23_s28, 128, %s25_s30, [#allocation3]  }
   0x9   :  { %s54_s11 = sshll.u32 %s1955_s3, 4  ;;  %s1500_s12 = smov [#allocation7]   ;;  %s55_s11 = int_to_ptr.hbm [resolvable:$true] %s54_s11 }
   0xa   :  { %s46_s13 = sshll.u32 %s1500_s12, 4  ;;  %s1501_s0 = smov [#allocation8]   ;;  %s47_s13 = int_to_ptr.vmem [resolvable:$true] %s46_s13 }
   0xb   :  { %49 = dma.hbm_to_vmem [thread:$0]  %s45_s9, 128, %s47_s13, [#allocation6]  }
   0xc   :  { %s56_s14 = sshll.u32 %s1501_s0, 4  ;;  %s1502_s15 = smov 256   ;;  %s57_s14 = int_to_ptr.vmem [resolvable:$true] %s56_s14 }
   0xd   :  { %s1503_s16 = smov 16  }
   0xe   :  { %62 = dma.hbm_to_vmem [thread:$0]  %s55_s11, 2048, %s57_s14, [#allocation9], %s1502_s15, %s1502_s15, %s1503_s16  }
   0xf   :  { %1488 = dma.done.wait [#allocation3], 128  }
  0x10   :  { %1489 = vsyncadd [#allocation3], 4294967168 }
  0x11   :  { %1490 = dma.done.wait [#allocation6], 256  }
  0x12   :  { %1491 = vsyncadd [#allocation6], 4294967040 }
  0x13   :  { %1492 = dma.done.wait [#allocation9], 2048  }
  0x14   :  { %1493 = vsyncadd [#allocation9], 4294965248  ;;  %v1569_v0 = vld [vmem:[#allocation8 + $0x78] sm:$0xff]  ;;  %v1571_v1 = vld [vmem:[#allocation8 + $0x68] sm:$0xff]  ;;  %v1504_v8 = vmov 0.0   ;;  %vm149_vm0 = vcmask 64512  }
  0x15   :  { %136 = vmatpush.msra.mxu1 %v1569_v0  ;;  %260 = vmatpush.msra.mxu2 %v1569_v0  ;;  %v1575_v2 = vld [vmem:[#allocation8 + $0x58] sm:$0xff]  ;;  %v1579_v3 = vld [vmem:[#allocation8 + $0x48] sm:$0xff]  ;;  %v1601_v9 = vld [vmem:[#allocation5] sm:$0xff]  ;;  %s1505_s17 = smov 64   ;;  %s1506_s18 = smov 32   ;;  %vm227_vm5 = vcmask 261120  }
  0x16   :  { %v1583_v4 = vld [vmem:[#allocation8 + $0x38] sm:$0xff]  ;;  %v1587_v5 = vld [vmem:[#allocation8 + $0x28] sm:$0xff]  ;;  %v1606_v18 = vld [vmem:[#allocation8 + $0x70] sm:$0xff]  ;;  %vm104_vm6 = vcmask 523264   ;;  %s1507_s19 = smov 120   ;;  %s1508_s20 = smov 112  }
  0x17   :  { %137 = vmatpush.msra.mxu1 %v1571_v1  ;;  %261 = vmatpush.msra.mxu2 %v1571_v1  ;;  %v1591_v6 = vld [vmem:[#allocation8 + $0x18] sm:$0xff]  ;;  %v1595_v7 = vld [vmem:[#allocation8 + $0x8] sm:$0xff]  ;;  %v1608_v19 = vld [vmem:[#allocation8 + $0x60] sm:$0xff]  ;;  %s1509_s21 = smov 104   ;;  %s1510_s22 = smov 96  }
  0x18   :  { %116 = vmatpush.msra.mxu0 %v1606_v18  ;;  %v1611_v20 = vld [vmem:[#allocation7] sm:$0xff]  ;;  %v1614_v21 = vld [vmem:[#allocation8 + $0x50] sm:$0xff]  ;;  %v1620_v22 = vld [vmem:[#allocation8 + $0x40] sm:$0xff]  ;;  %s1511_s23 = smov 88   ;;  %s1512_s24 = smov 80  }
  0x19   :  { %138 = vmatpush.msra.mxu1 %v1575_v2  ;;  %262 = vmatpush.msra.mxu2 %v1575_v2  ;;  %v1625_v23 = vld [vmem:[#allocation8 + $0x30] sm:$0xff]  ;;  %v1634_v24 = vld [vmem:[#allocation8 + $0x20] sm:$0xff]  ;;  %v1660_v29 = vld [vmem:[#allocation2] sm:$0xff]  ;;  %s1513_s25 = smov 72   ;;  %s1514_s26 = smov 8  }
  0x1a   :  { %180 = vmatpush.msra.mxu3 %v1611_v20  ;;  %117 = vmatpush.msra.mxu0 %v1608_v19  ;;  %v1636_v25 = vld [vmem:[#allocation8 + $0x10] sm:$0xff]  ;;  %v1641_v26 = vld [vmem:[#allocation8] sm:$0xff]  ;;  %v1678_v33 = vld [vmem:[%s1956_s4] ss:$0 sm:$0xff]  ;;  %s1515_s27 = smov 24   ;;  %s1516_s28 = smov 40  }
  0x1b   :  { %139 = vmatpush.msra.mxu1 %v1579_v3  ;;  %263 = vmatpush.msra.mxu2 %v1579_v3  ;;  %s1518_s7 = smov 56   ;;  %s1519_s8 = smov [#allocation11]  }
  0x1c   :  { %240 = vmatpush.msrb.mxu3 %v1606_v18  ;;  %118 = vmatpush.msra.mxu0 %v1614_v21  ;;  %s1172_s9 = sshll.u32 %s1519_s8, 4  ;;  %s1174_s11 = sshll.u32 %s1958_s6, 4  ;;  %s1173_s9 = int_to_ptr.vmem [resolvable:$true] %s1172_s9  ;;  %s1175_s11 = int_to_ptr.hbm [resolvable:$true] %s1174_s11 }
  0x1d   :  { %140 = vmatpush.msra.mxu1 %v1583_v4  ;;  %264 = vmatpush.msra.mxu2 %v1583_v4  ;;  %s1520_s12 = smov [#allocation10]   ;;  %s1163_s15 = sshll.u32 %s1957_s5, 4  ;;  %s1164_s15 = int_to_ptr.hbm [resolvable:$true] %s1163_s15 }
  0x1e   :  { %241 = vmatpush.msrb.mxu3 %v1608_v19  ;;  %119 = vmatpush.msra.mxu0 %v1620_v22  ;;  %s1161_s13 = sshll.u32 %s1520_s12, 4  ;;  %s1162_s13 = int_to_ptr.vmem [resolvable:$true] %s1161_s13 }
  0x1f   :  { %141 = vmatpush.msra.mxu1 %v1587_v5  ;;  %265 = vmatpush.msra.mxu2 %v1587_v5 }
  0x20   :  { %242 = vmatpush.msrb.mxu3 %v1614_v21  ;;  %120 = vmatpush.msra.mxu0 %v1625_v23 }
  0x21   :  { %142 = vmatpush.msra.mxu1 %v1591_v6  ;;  %266 = vmatpush.msra.mxu2 %v1591_v6 }
  0x22   :  { %243 = vmatpush.msrb.mxu3 %v1620_v22  ;;  %121 = vmatpush.msra.mxu0 %v1634_v24 }
  0x23   :  { %143 = vmatpush.msra.mxu1 %v1595_v7  ;;  %267 = vmatpush.msra.mxu2 %v1595_v7 }
  0x24   :  { %144 = vmatmul.f32.vlgmr.msra.gmra.mxu1 %v1504_v8  ;;  %244 = vmatpush.msrb.mxu3 %v1625_v23 }
  0x25   :  { %366 = vmatpush.msrb.mxu1 %v1606_v18  ;;  %432 = vmatpush.msrb.mxu2 %v1611_v20 }
  0x26   :  { %245 = vmatpush.msrb.mxu3 %v1634_v24  ;;  %122 = vmatpush.msra.mxu0 %v1636_v25 }
  0x27   :  { %367 = vmatpush.msrb.mxu1 %v1608_v19 }
  0x28   :  { %246 = vmatpush.msrb.mxu3 %v1636_v25  ;;  %123 = vmatpush.msra.mxu0 %v1641_v26 }
  0x29   :  { %368 = vmatpush.msrb.mxu1 %v1614_v21  ;;  %124 = vmatmul.f32.vlgmr.msra.gmra.mxu0 %v1504_v8 }
  0x2a   :  { %247 = vmatpush.msrb.mxu3 %v1641_v26  ;;  %307 = vmatpush.msrb.mxu0 %v1611_v20 }
  0x2b   :  { %369 = vmatpush.msrb.mxu1 %v1620_v22 }
  0x2c   :  { %491 = vmatpush.msra.mxu0 %v1606_v18 }
  0x2d   :  { %370 = vmatpush.msrb.mxu1 %v1625_v23 }
  0x2e   :  { %492 = vmatpush.msra.mxu0 %v1608_v19 }
  0x2f   :  { %371 = vmatpush.msrb.mxu1 %v1634_v24 }
  0x30   :  { %493 = vmatpush.msra.mxu0 %v1614_v21 }
  0x31   :  { %372 = vmatpush.msrb.mxu1 %v1636_v25 }
  0x32   :  { %494 = vmatpush.msra.mxu0 %v1620_v22 }
  0x33   :  { %373 = vmatpush.msrb.mxu1 %v1641_v26 }
  0x34   :  { %495 = vmatpush.msra.mxu0 %v1625_v23 }
  0x35   :  { %557 = vmatpush.msra.mxu1 %v1611_v20 }
  0x36   :  { %496 = vmatpush.msra.mxu0 %v1634_v24 }
  0x38   :  { %497 = vmatpush.msra.mxu0 %v1636_v25 }
  0x3a   :  { %498 = vmatpush.msra.mxu0 %v1641_v26 }
  0xa1   :  { %v145_v10 = vpop.f32.mrf.mxu1 }
  0xa2   :  { %v148_v11 = vadd.f32 %v145_v10, %v1601_v9 }
  0xa4   :  { %v150_v12 = vsel %vm149_vm0, %v148_v11, -inf }
  0xa5   :  { %151 = vmax.xlane.f32.xlu0 %v150_v12 }
  0xa6   :  { %v125_v32 = vpop.f32.mrf.mxu0 }
 0x118   :  { %v152_v13 = vpop.xlane.xlu0 %151 }
 0x119   :  { %v153_v14 = vsub.f32 %v148_v11, %v152_v13 }
 0x11b   :  { %v154_v15 = vmul.f32 1.442695, %v153_v14 }
 0x11d   :  { %1245 = vpow2.f32 %v154_v15 }
 0x123   :  { %v1246_v16 = vpop.eup %1245 }
 0x124   :  { %v156_v17 = vsel %vm149_vm0, %v1246_v16, 0.0 }
 0x125   :  { %157 = vadd.xlane.f32.xlu0 %v156_v17 }
 0x198   :  { %v158_v27 = vpop.xlane.xlu0 %157 }
 0x199   :  { %1247 = vrcp.f32 %v158_v27 }
 0x19f   :  { %v1248_v28 = vpop.eup %1247 }
 0x1a0   :  { %v160_v30 = vmul.f32 %v1248_v28, %v1246_v16 }
 0x1a2   :  { %v1663_v31 = vmul.f32 %v160_v30, %v1660_v29 }
 0x1a4   :  { %1191 = vmatmul.msk.f32.vlgmr.msra.gmra.mxu3 %vm149_vm0, %v1663_v31 }
 0x1a5   :  { %386 = vmatpush.msra.mxu3 %v1569_v0 }
 0x1a7   :  { %387 = vmatpush.msra.mxu3 %v1571_v1 }
 0x1a9   :  { %388 = vmatpush.msra.mxu3 %v1575_v2 }
 0x1ab   :  { %389 = vmatpush.msra.mxu3 %v1579_v3 }
 0x1ad   :  { %390 = vmatpush.msra.mxu3 %v1583_v4 }
 0x1af   :  { %391 = vmatpush.msra.mxu3 %v1587_v5 }
 0x1b1   :  { %392 = vmatpush.msra.mxu3 %v1591_v6 }
 0x1b3   :  { %393 = vmatpush.msra.mxu3 %v1595_v7 }
 0x227   :  { %v182_v34 = vpop.f32.mrf.mxu3 }
 0x228   :  { %v183_v35 = vadd.f32 %v182_v34, %v125_v32 }
 0x22a   :  { %v185_v36 = vadd.f32 %v1678_v33, %v183_v35 }
 0x22c   :  { %1249 = vtanh.f32 %v185_v36  ;;  %v1192_v38 = vmul.f32 -1.442695, %v185_v36 }
 0x22e   :  { %1251 = vpow2.f32 %v1192_v38 }
 0x232   :  { %v1250_v37 = vpop.eup %1249 }
 0x233   :  { %208 = vrot.lane.b32.xlu1 %v1250_v37, %s1505_s17 }
 0x234   :  { %v1252_v39 = vpop.eup %1251 }
 0x235   :  { %v189_v40 = vadd.f32 1.0, %v1252_v39 }
 0x237   :  { %1253 = vrcp.f32 %v189_v40  ;;  %v201_v46 = vand.u32 2147483648, %v189_v40  ;;  %vm195_vm2 = vweird.f32 %v189_v40  ;;  %v199_v47 = vand.u32 2147483647, %v189_v40 }
 0x239   :  { %v202_v49 = vor.u32 1.1754944e-38, %v201_v46  ;;  %vm200_vm4 = vcmp.eq.f32.partialorder %v199_v47, 8.507059e+37 }
 0x23d   :  { %v1254_v41 = vpop.eup %1253 }
 0x23e   :  { %v191_v42 = vmul.f32 %v1254_v41, %v189_v40  ;;  %vm196_vm1 = vweird.f32 %v1254_v41 }
 0x23f   :  { %vm197_vm3 = vmor %vm195_vm2, %vm196_vm1 }
 0x240   :  { %v192_v43 = vsub.f32 1.0, %v191_v42 }
 0x242   :  { %v193_v44 = vmul.f32 %v1254_v41, %v192_v43 }
 0x244   :  { %v194_v45 = vadd.f32 %v1254_v41, %v193_v44 }
 0x246   :  { %v198_v48 = vsel %vm197_vm3, %v1254_v41, %v194_v45 }
 0x247   :  { %v203_v51 = vsel %vm200_vm4, %v202_v49, %v198_v48 }
 0x248   :  { %v206_v53 = vmul.f32 0.0, %v203_v51 }
 0x2a5   :  { %v209_v50 = vpop.permute.xlu1 %208 }
 0x2a6   :  { %v211_v52 = vmul.f32 %v209_v50, %v203_v51 }
 0x2a8   :  { %213 = vrot.lane.b32.xlu1 %v211_v52, %s1506_s18 }
 0x31a   :  { %v214_v54 = vpop.permute.xlu1 %213 }
 0x31b   :  { %v1683_v55 = vadd.f32 %v214_v54, %v206_v53 }
 0x31d   :  { %1255 = vtanh.f32 %v1683_v55 }
 0x323   :  { %v1256_v56 = vpop.eup %1255 }
 0x324   :  { %219 = vrot.lane.b32.xlu2 %v1256_v56, %s1505_s17 }
 0x37e   :  { %v220_v57 = vpop.permute.xlu2 %219 }
 0x37f   :  { %v222_v58 = vmul.f32 %v220_v57, %v203_v51 }
 0x381   :  { %224 = vrot.lane.b32.xlu2 %v222_v58, %s1506_s18 }
 0x389   :  { %285 = vrot.lane.b32.xlu2 %v1660_v29, %s1507_s19 }
 0x3db   :  { %v1688_v59 = vpop.permute.xlu2 %224 }
 0x3dc   :  { %v228_v60 = vsel %vm227_vm5, %v1688_v59, %v1683_v55 }
 0x3dd   :  { %1193 = vmatmul.msk.f32.vlgmr.msrb.gmra.mxu3 %vm104_vm6, %v228_v60  ;;  %1194 = vmatmul.msk.f32.vlgmr.msra.gmra.mxu2 %vm104_vm6, %v228_v60 }
 0x3de   :  { %511 = vmatpush.msra.mxu2 %v1569_v0  ;;  %616 = vmatpush.msrb.mxu3 %v1606_v18 }
 0x3e0   :  { %512 = vmatpush.msra.mxu2 %v1571_v1  ;;  %617 = vmatpush.msrb.mxu3 %v1608_v19 }
 0x3e2   :  { %513 = vmatpush.msra.mxu2 %v1575_v2  ;;  %618 = vmatpush.msrb.mxu3 %v1614_v21 }
 0x3e3   :  { %v286_v16 = vpop.permute.xlu2 %285 }
 0x3e4   :  { %514 = vmatpush.msra.mxu2 %v1579_v3  ;;  %619 = vmatpush.msrb.mxu3 %v1620_v22 }
 0x3e6   :  { %515 = vmatpush.msra.mxu2 %v1583_v4  ;;  %620 = vmatpush.msrb.mxu3 %v1625_v23 }
 0x3e8   :  { %516 = vmatpush.msra.mxu2 %v1587_v5  ;;  %621 = vmatpush.msrb.mxu3 %v1634_v24 }
 0x3ea   :  { %517 = vmatpush.msra.mxu2 %v1591_v6  ;;  %622 = vmatpush.msrb.mxu3 %v1636_v25 }
 0x3ec   :  { %518 = vmatpush.msra.mxu2 %v1595_v7  ;;  %623 = vmatpush.msrb.mxu3 %v1641_v26 }
 0x460   :  { %v269_v61 = vpop.f32.mrf.mxu2  ;;  %v249_v28 = vpop.f32.mrf.mxu3 }
 0x461   :  { %v272_v62 = vadd.f32 %v269_v61, %v1601_v9 }
 0x463   :  { %v273_v63 = vsel %vm149_vm0, %v272_v62, -inf }
 0x464   :  { %274 = vmax.xlane.f32.xlu0 %v273_v63 }
 0x4d7   :  { %v275_v8 = vpop.xlane.xlu0 %274 }
 0x4d8   :  { %v276_v10 = vsub.f32 %v272_v62, %v275_v8 }
 0x4da   :  { %v277_v11 = vmul.f32 1.442695, %v276_v10 }
 0x4dc   :  { %1257 = vpow2.f32 %v277_v11 }
 0x4e2   :  { %v1258_v12 = vpop.eup %1257 }
 0x4e3   :  { %v279_v13 = vsel %vm149_vm0, %v1258_v12, 0.0 }
 0x4e4   :  { %280 = vadd.xlane.f32.xlu1 %v279_v13 }
 0x4fd   :  { %410 = vrot.lane.b32.xlu1 %v1660_v29, %s1508_s20 }
 0x557   :  { %v281_v14 = vpop.xlane.xlu1 %280 }
 0x558   :  { %1259 = vrcp.f32 %v281_v14 }
 0x55e   :  { %v1260_v15 = vpop.eup %1259 }
 0x55f   :  { %v283_v17 = vmul.f32 %v1260_v15, %v1258_v12 }
 0x561   :  { %v1715_v27 = vmul.f32 %v286_v16, %v283_v17 }
 0x563   :  { %1195 = vmatmul.msk.f32.vlgmr.msrb.gmra.mxu0 %vm149_vm0, %v1715_v27 }
 0x564   :  { %636 = vmatpush.msrb.mxu0 %v1569_v0 }
 0x566   :  { %637 = vmatpush.msrb.mxu0 %v1571_v1 }
 0x568   :  { %638 = vmatpush.msrb.mxu0 %v1575_v2 }
 0x56a   :  { %639 = vmatpush.msrb.mxu0 %v1579_v3 }
 0x56c   :  { %640 = vmatpush.msrb.mxu0 %v1583_v4 }
 0x56e   :  { %641 = vmatpush.msrb.mxu0 %v1587_v5 }
 0x56f   :  { %v411_v15 = vpop.permute.xlu1 %410 }
 0x570   :  { %642 = vmatpush.msrb.mxu0 %v1591_v6 }
 0x572   :  { %643 = vmatpush.msrb.mxu0 %v1595_v7 }
 0x5e0   :  { %v309_v30 = vpop.f32.mrf.mxu0 }
 0x5e1   :  { %v310_v32 = vadd.f32 %v309_v30, %v249_v28 }
 0x5e3   :  { %v312_v34 = vadd.f32 %v1678_v33, %v310_v32 }
 0x5e5   :  { %1261 = vtanh.f32 %v312_v34  ;;  %v1196_v36 = vmul.f32 -1.442695, %v312_v34 }
 0x5e7   :  { %1263 = vpow2.f32 %v1196_v36 }
 0x5eb   :  { %v1262_v35 = vpop.eup %1261 }
 0x5ec   :  { %335 = vrot.lane.b32.xlu0 %v1262_v35, %s1505_s17 }
 0x5ed   :  { %v1264_v37 = vpop.eup %1263 }
 0x5ee   :  { %v316_v38 = vadd.f32 1.0, %v1264_v37 }
 0x5f0   :  { %1265 = vrcp.f32 %v316_v38  ;;  %v328_v44 = vand.u32 2147483648, %v316_v38  ;;  %vm322_vm8 = vweird.f32 %v316_v38  ;;  %v326_v45 = vand.u32 2147483647, %v316_v38 }
 0x5f2   :  { %v329_v47 = vor.u32 1.1754944e-38, %v328_v44  ;;  %vm327_vm10 = vcmp.eq.f32.partialorder %v326_v45, 8.507059e+37 }
 0x5f6   :  { %v1266_v39 = vpop.eup %1265 }
 0x5f7   :  { %v318_v40 = vmul.f32 %v1266_v39, %v316_v38  ;;  %vm323_vm7 = vweird.f32 %v1266_v39 }
 0x5f8   :  { %vm324_vm9 = vmor %vm322_vm8, %vm323_vm7 }
 0x5f9   :  { %v319_v41 = vsub.f32 1.0, %v318_v40 }
 0x5fb   :  { %v320_v42 = vmul.f32 %v1266_v39, %v319_v41 }
 0x5fd   :  { %v321_v43 = vadd.f32 %v1266_v39, %v320_v42 }
 0x5ff   :  { %v325_v46 = vsel %vm324_vm9, %v1266_v39, %v321_v43 }
 0x600   :  { %v330_v49 = vsel %vm327_vm10, %v329_v47, %v325_v46 }
 0x601   :  { %v333_v51 = vmul.f32 %v330_v49, %v1683_v55 }
 0x65e   :  { %v336_v48 = vpop.permute.xlu0 %335 }
 0x65f   :  { %v338_v50 = vmul.f32 %v336_v48, %v330_v49 }
 0x661   :  { %340 = vrot.lane.b32.xlu2 %v338_v50, %s1506_s18 }
 0x6bb   :  { %v341_v52 = vpop.permute.xlu2 %340 }
 0x6bc   :  { %v1731_v53 = vadd.f32 %v341_v52, %v333_v51 }
 0x6be   :  { %1267 = vtanh.f32 %v1731_v53 }
 0x6c4   :  { %v1268_v54 = vpop.eup %1267 }
 0x6c5   :  { %346 = vrot.lane.b32.xlu2 %v1268_v54, %s1505_s17 }
 0x71f   :  { %v347_v56 = vpop.permute.xlu2 %346 }
 0x720   :  { %v1735_v57 = vmul.f32 %v347_v56, %v330_v49 }
 0x722   :  { %351 = vrot.lane.b32.xlu2 %v1735_v57, %s1506_s18 }
 0x77c   :  { %v352_v58 = vpop.permute.xlu2 %351 }
 0x77d   :  { %v354_v60 = vsel %vm227_vm5, %v352_v58, %v1731_v53 }
 0x77e   :  { %1197 = vmatmul.msk.f32.vlgmr.msrb.gmra.mxu1 %vm104_vm6, %v354_v60  ;;  %1198 = vmatmul.msk.f32.vlgmr.msra.gmra.mxu3 %vm104_vm6, %v354_v60 }
 0x77f   :  { %682 = vmatpush.msrb.mxu1 %v1611_v20  ;;  %807 = vmatpush.msra.mxu3 %v1611_v20 }
 0x7fb   :  { %v375_v28 = vpop.f32.mrf.mxu1 }
 0x801   :  { %v395_v55 = vpop.f32.mrf.mxu3 }
 0x802   :  { %v398_v61 = vadd.f32 %v395_v55, %v1601_v9 }
 0x804   :  { %v399_v62 = vsel %vm149_vm0, %v398_v61, -inf }
 0x805   :  { %400 = vmax.xlane.f32.xlu0 %v399_v62 }
 0x878   :  { %v401_v63 = vpop.xlane.xlu0 %400 }
 0x879   :  { %v402_v8 = vsub.f32 %v398_v61, %v401_v63 }
 0x87b   :  { %v403_v10 = vmul.f32 1.442695, %v402_v8 }
 0x87d   :  { %1269 = vpow2.f32 %v403_v10 }
 0x883   :  { %v1270_v11 = vpop.eup %1269 }
 0x884   :  { %v405_v12 = vsel %vm149_vm0, %v1270_v11, 0.0 }
 0x885   :  { %406 = vadd.xlane.f32.xlu2 %v405_v12 }
 0x8f8   :  { %v407_v13 = vpop.xlane.xlu2 %406 }
 0x8f9   :  { %1271 = vrcp.f32 %v407_v13 }
 0x8ff   :  { %v1272_v14 = vpop.eup %1271 }
 0x900   :  { %v409_v16 = vmul.f32 %v1272_v14, %v1270_v11 }
 0x902   :  { %v1749_v17 = vmul.f32 %v411_v15, %v409_v16 }
 0x904   :  { %1199 = vmatmul.msk.f32.vlgmr.msrb.gmra.mxu2 %vm149_vm0, %v1749_v17 }
 0x905   :  { %741 = vmatpush.msrb.mxu2 %v1606_v18 }
 0x907   :  { %742 = vmatpush.msrb.mxu2 %v1608_v19 }
 0x909   :  { %743 = vmatpush.msrb.mxu2 %v1614_v21 }
 0x90b   :  { %744 = vmatpush.msrb.mxu2 %v1620_v22 }
 0x90d   :  { %745 = vmatpush.msrb.mxu2 %v1625_v23 }
 0x90f   :  { %746 = vmatpush.msrb.mxu2 %v1634_v24 }
 0x911   :  { %747 = vmatpush.msrb.mxu2 %v1636_v25 }
 0x913   :  { %748 = vmatpush.msrb.mxu2 %v1641_v26 }
 0x987   :  { %v434_v30 = vpop.f32.mrf.mxu2 }
 0x988   :  { %v435_v32 = vadd.f32 %v434_v30, %v375_v28 }
 0x98a   :  { %v437_v34 = vadd.f32 %v1678_v33, %v435_v32 }
 0x98c   :  { %1273 = vtanh.f32 %v437_v34  ;;  %v1200_v36 = vmul.f32 -1.442695, %v437_v34 }
 0x98e   :  { %1275 = vpow2.f32 %v1200_v36 }
 0x992   :  { %v1274_v35 = vpop.eup %1273 }
 0x993   :  { %460 = vrot.lane.b32.xlu1 %v1274_v35, %s1505_s17 }
 0x994   :  { %v1276_v37 = vpop.eup %1275 }
 0x995   :  { %v441_v38 = vadd.f32 1.0, %v1276_v37 }
 0x997   :  { %1277 = vrcp.f32 %v441_v38  ;;  %v453_v44 = vand.u32 2147483648, %v441_v38  ;;  %vm447_vm12 = vweird.f32 %v441_v38  ;;  %v451_v45 = vand.u32 2147483647, %v441_v38 }
 0x999   :  { %v454_v47 = vor.u32 1.1754944e-38, %v453_v44  ;;  %vm452_vm14 = vcmp.eq.f32.partialorder %v451_v45, 8.507059e+37 }
 0x99d   :  { %v1278_v39 = vpop.eup %1277 }
 0x99e   :  { %v443_v40 = vmul.f32 %v1278_v39, %v441_v38  ;;  %vm448_vm11 = vweird.f32 %v1278_v39 }
 0x99f   :  { %vm449_vm13 = vmor %vm447_vm12, %vm448_vm11 }
 0x9a0   :  { %v444_v41 = vsub.f32 1.0, %v443_v40 }
 0x9a2   :  { %v445_v42 = vmul.f32 %v1278_v39, %v444_v41 }
 0x9a4   :  { %v446_v43 = vadd.f32 %v1278_v39, %v445_v42 }
 0x9a6   :  { %v450_v46 = vsel %vm449_vm13, %v1278_v39, %v446_v43 }
 0x9a7   :  { %v455_v49 = vsel %vm452_vm14, %v454_v47, %v450_v46 }
 0x9a8   :  { %v458_v51 = vmul.f32 %v455_v49, %v1731_v53 }
 0xa05   :  { %v461_v48 = vpop.permute.xlu1 %460 }
 0xa06   :  { %v463_v50 = vmul.f32 %v461_v48, %v455_v49 }
 0xa08   :  { %465 = vrot.lane.b32.xlu0 %v463_v50, %s1506_s18 }
 0xa7a   :  { %v466_v52 = vpop.permute.xlu0 %465 }
 0xa7b   :  { %v1765_v54 = vadd.f32 %v466_v52, %v458_v51 }
 0xa7d   :  { %1279 = vtanh.f32 %v1765_v54 }
 0xa83   :  { %v1280_v56 = vpop.eup %1279 }
 0xa84   :  { %471 = vrot.lane.b32.xlu2 %v1280_v56, %s1505_s17 }
 0xa8c   :  { %535 = vrot.lane.b32.xlu2 %v1660_v29, %s1509_s21 }
 0xade   :  { %v472_v58 = vpop.permute.xlu2 %471 }
 0xadf   :  { %v1769_v60 = vmul.f32 %v472_v58, %v455_v49 }
 0xae1   :  { %476 = vrot.lane.b32.xlu1 %v1769_v60, %s1506_s18 }
 0xae6   :  { %v536_v16 = vpop.permute.xlu2 %535 }
 0xb53   :  { %v477_v55 = vpop.permute.xlu1 %476 }
 0xb54   :  { %v479_v61 = vsel %vm227_vm5, %v477_v55, %v1765_v54 }
 0xb55   :  { %1201 = vmatmul.msk.f32.vlgmr.msra.gmra.mxu0 %vm104_vm6, %v479_v61  ;;  %1202 = vmatmul.msk.f32.vlgmr.msra.gmra.mxu2 %vm104_vm6, %v479_v61 }
 0xb56   :  { %866 = vmatpush.msra.mxu0 %v1606_v18  ;;  %932 = vmatpush.msra.mxu2 %v1611_v20 }
 0xb58   :  { %867 = vmatpush.msra.mxu0 %v1608_v19 }
 0xb5a   :  { %868 = vmatpush.msra.mxu0 %v1614_v21 }
 0xb5c   :  { %869 = vmatpush.msra.mxu0 %v1620_v22 }
 0xb5e   :  { %870 = vmatpush.msra.mxu0 %v1625_v23 }
 0xb60   :  { %871 = vmatpush.msra.mxu0 %v1634_v24 }
 0xb62   :  { %872 = vmatpush.msra.mxu0 %v1636_v25 }
 0xb64   :  { %873 = vmatpush.msra.mxu0 %v1641_v26 }
 0xbd2   :  { %v500_v32 = vpop.f32.mrf.mxu0 }
 0xbd8   :  { %v520_v53 = vpop.f32.mrf.mxu2 }
 0xbd9   :  { %v523_v62 = vadd.f32 %v520_v53, %v1601_v9 }
 0xbdb   :  { %v524_v63 = vsel %vm149_vm0, %v523_v62, -inf }
 0xbdc   :  { %525 = vmax.xlane.f32.xlu1 %v524_v63 }
 0xc4f   :  { %v526_v8 = vpop.xlane.xlu1 %525 }
 0xc50   :  { %v527_v10 = vsub.f32 %v523_v62, %v526_v8 }
 0xc52   :  { %v528_v11 = vmul.f32 1.442695, %v527_v10 }
 0xc54   :  { %1281 = vpow2.f32 %v528_v11 }
 0xc5a   :  { %v1282_v12 = vpop.eup %1281 }
 0xc5b   :  { %v530_v13 = vsel %vm149_vm0, %v1282_v12, 0.0 }
 0xc5c   :  { %531 = vadd.xlane.f32.xlu0 %v530_v13 }
 0xccf   :  { %v532_v14 = vpop.xlane.xlu0 %531 }
 0xcd0   :  { %1283 = vrcp.f32 %v532_v14 }
 0xcd6   :  { %v1284_v15 = vpop.eup %1283 }
 0xcd7   :  { %v534_v28 = vmul.f32 %v1284_v15, %v1282_v12 }
 0xcd9   :  { %v1790_v30 = vmul.f32 %v536_v16, %v534_v28 }
 0xcdb   :  { %1203 = vmatmul.msk.f32.vlgmr.msra.gmra.mxu1 %vm149_vm0, %v1790_v30 }
 0xcdc   :  { %761 = vmatpush.msra.mxu1 %v1569_v0 }
 0xcde   :  { %762 = vmatpush.msra.mxu1 %v1571_v1 }
 0xce0   :  { %763 = vmatpush.msra.mxu1 %v1575_v2 }
 0xce2   :  { %764 = vmatpush.msra.mxu1 %v1579_v3 }
 0xce4   :  { %765 = vmatpush.msra.mxu1 %v1583_v4 }
 0xce6   :  { %766 = vmatpush.msra.mxu1 %v1587_v5 }
 0xce8   :  { %767 = vmatpush.msra.mxu1 %v1591_v6 }
 0xcea   :  { %768 = vmatpush.msra.mxu1 %v1595_v7 }
 0xd58   :  { %v559_v34 = vpop.f32.mrf.mxu1 }
 0xd59   :  { %v560_v35 = vadd.f32 %v559_v34, %v500_v32 }
 0xd5b   :  { %v562_v36 = vadd.f32 %v1678_v33, %v560_v35 }
 0xd5d   :  { %1285 = vtanh.f32 %v562_v36  ;;  %v1204_v38 = vmul.f32 -1.442695, %v562_v36 }
 0xd5f   :  { %1287 = vpow2.f32 %v1204_v38 }
 0xd63   :  { %v1286_v37 = vpop.eup %1285 }
 0xd64   :  { %585 = vrot.lane.b32.xlu2 %v1286_v37, %s1505_s17 }
 0xd65   :  { %v1288_v39 = vpop.eup %1287 }
 0xd66   :  { %v566_v40 = vadd.f32 1.0, %v1288_v39 }
 0xd68   :  { %1289 = vrcp.f32 %v566_v40  ;;  %v578_v46 = vand.u32 2147483648, %v566_v40  ;;  %vm572_vm1 = vweird.f32 %v566_v40  ;;  %v576_v47 = vand.u32 2147483647, %v566_v40 }
 0xd6a   :  { %v579_v49 = vor.u32 1.1754944e-38, %v578_v46  ;;  %vm577_vm3 = vcmp.eq.f32.partialorder %v576_v47, 8.507059e+37 }
 0xd6e   :  { %v1290_v41 = vpop.eup %1289 }
 0xd6f   :  { %v568_v42 = vmul.f32 %v1290_v41, %v566_v40  ;;  %vm573_vm15 = vweird.f32 %v1290_v41 }
 0xd70   :  { %vm574_vm2 = vmor %vm572_vm1, %vm573_vm15 }
 0xd71   :  { %v569_v43 = vsub.f32 1.0, %v568_v42 }
 0xd73   :  { %v570_v44 = vmul.f32 %v1290_v41, %v569_v43 }
 0xd75   :  { %v571_v45 = vadd.f32 %v1290_v41, %v570_v44 }
 0xd77   :  { %v575_v48 = vsel %vm574_vm2, %v1290_v41, %v571_v45 }
 0xd78   :  { %v580_v51 = vsel %vm577_vm3, %v579_v49, %v575_v48 }
 0xd79   :  { %v583_v56 = vmul.f32 %v580_v51, %v1765_v54 }
 0xdbe   :  { %v586_v50 = vpop.permute.xlu2 %585 }
 0xdbf   :  { %v588_v52 = vmul.f32 %v586_v50, %v580_v51 }
 0xdc1   :  { %590 = vrot.lane.b32.xlu2 %v588_v52, %s1506_s18 }
 0xe1b   :  { %v591_v58 = vpop.permute.xlu2 %590 }
 0xe1c   :  { %v1806_v55 = vadd.f32 %v591_v58, %v583_v56 }
 0xe1e   :  { %1291 = vtanh.f32 %v1806_v55 }
 0xe24   :  { %v1292_v61 = vpop.eup %1291 }
 0xe25   :  { %596 = vrot.lane.b32.xlu2 %v1292_v61, %s1505_s17 }
 0xe7f   :  { %v597_v53 = vpop.permute.xlu2 %596 }
 0xe80   :  { %v1810_v62 = vmul.f32 %v597_v53, %v580_v51 }
 0xe82   :  { %601 = vrot.lane.b32.xlu1 %v1810_v62, %s1506_s18 }
 0xef4   :  { %v602_v63 = vpop.permute.xlu1 %601 }
 0xef5   :  { %v604_v8 = vsel %vm227_vm5, %v602_v63, %v1806_v55 }
 0xef6   :  { %1205 = vmatmul.msk.f32.vlgmr.msrb.gmra.mxu3 %vm104_vm6, %v604_v8  ;;  %1206 = vmatmul.msk.f32.vlgmr.msrb.gmra.mxu0 %vm104_vm6, %v604_v8 }
 0xef7   :  { %886 = vmatpush.msrb.mxu3 %v1569_v0  ;;  %1057 = vmatpush.msrb.mxu0 %v1611_v20 }
 0xef9   :  { %887 = vmatpush.msrb.mxu3 %v1571_v1 }
 0xefb   :  { %888 = vmatpush.msrb.mxu3 %v1575_v2 }
 0xefd   :  { %889 = vmatpush.msrb.mxu3 %v1579_v3 }
 0xeff   :  { %890 = vmatpush.msrb.mxu3 %v1583_v4 }
 0xf01   :  { %891 = vmatpush.msrb.mxu3 %v1587_v5 }
 0xf03   :  { %892 = vmatpush.msrb.mxu3 %v1591_v6 }
 0xf05   :  { %893 = vmatpush.msrb.mxu3 %v1595_v7 }
 0xf73   :  { %v645_v54 = vpop.f32.mrf.mxu0 }
 0xf74   :  { %v648_v10 = vadd.f32 %v645_v54, %v1601_v9 }
 0xf76   :  { %v649_v11 = vsel %vm149_vm0, %v648_v10, -inf }
 0xf77   :  { %650 = vmax.xlane.f32.xlu2 %v649_v11 }
 0xf79   :  { %v625_v36 = vpop.f32.mrf.mxu3 }
 0xfea   :  { %v651_v20 = vpop.xlane.xlu2 %650 }
 0xfeb   :  { %v652_v12 = vsub.f32 %v648_v10, %v651_v20 }
 0xfed   :  { %v653_v13 = vmul.f32 1.442695, %v652_v12 }
 0xfef   :  { %1293 = vpow2.f32 %v653_v13 }
 0xff5   :  { %v1294_v14 = vpop.eup %1293 }
 0xff6   :  { %v655_v15 = vsel %vm149_vm0, %v1294_v14, 0.0 }
 0xff7   :  { %656 = vadd.xlane.f32.xlu0 %v655_v15 }
0x100b   :  { %660 = vrot.lane.b32.xlu0 %v1660_v29, %s1510_s22 }
0x106a   :  { %v657_v16 = vpop.xlane.xlu0 %656 }
0x106b   :  { %1295 = vrcp.f32 %v657_v16 }
0x1071   :  { %v1296_v28 = vpop.eup %1295 }
0x1072   :  { %v659_v32 = vmul.f32 %v1296_v28, %v1294_v14 }
0x107d   :  { %v661_v34 = vpop.permute.xlu0 %660 }
0x107e   :  { %v1832_v35 = vmul.f32 %v661_v34, %v659_v32 }
0x1080   :  { %1207 = vmatmul.msk.f32.vlgmr.msrb.gmra.mxu1 %vm149_vm0, %v1832_v35 }
0x1081   :  { %991 = vmatpush.msrb.mxu1 %v1606_v18 }
0x1083   :  { %992 = vmatpush.msrb.mxu1 %v1608_v19 }
0x1085   :  { %993 = vmatpush.msrb.mxu1 %v1614_v21 }
0x1087   :  { %994 = vmatpush.msrb.mxu1 %v1620_v22 }
0x1089   :  { %995 = vmatpush.msrb.mxu1 %v1625_v23 }
0x108b   :  { %996 = vmatpush.msrb.mxu1 %v1634_v24 }
0x108d   :  { %997 = vmatpush.msrb.mxu1 %v1636_v25 }
0x108f   :  { %998 = vmatpush.msrb.mxu1 %v1641_v26 }
0x10fd   :  { %v684_v37 = vpop.f32.mrf.mxu1 }
0x10fe   :  { %v685_v38 = vadd.f32 %v684_v37, %v625_v36 }
0x1100   :  { %v687_v39 = vadd.f32 %v1678_v33, %v685_v38 }
0x1102   :  { %1297 = vtanh.f32 %v687_v39  ;;  %v1208_v19 = vmul.f32 -1.442695, %v687_v39 }
0x1104   :  { %1299 = vpow2.f32 %v1208_v19 }
0x1108   :  { %v1298_v18 = vpop.eup %1297 }
0x1109   :  { %710 = vrot.lane.b32.xlu1 %v1298_v18, %s1505_s17 }
0x110a   :  { %v1300_v21 = vpop.eup %1299 }
0x110b   :  { %v691_v22 = vadd.f32 1.0, %v1300_v21 }
0x110d   :  { %1301 = vrcp.f32 %v691_v22  ;;  %v703_v26 = vand.u32 2147483648, %v691_v22  ;;  %vm697_vm7 = vweird.f32 %v691_v22  ;;  %v701_v42 = vand.u32 2147483647, %v691_v22 }
0x110f   :  { %v704_v44 = vor.u32 1.1754944e-38, %v703_v26  ;;  %vm702_vm9 = vcmp.eq.f32.partialorder %v701_v42, 8.507059e+37 }
0x1113   :  { %v1302_v23 = vpop.eup %1301 }
0x1114   :  { %v693_v24 = vmul.f32 %v1302_v23, %v691_v22  ;;  %vm698_vm4 = vweird.f32 %v1302_v23 }
0x1115   :  { %vm699_vm8 = vmor %vm697_vm7, %vm698_vm4 }
0x1116   :  { %v694_v40 = vsub.f32 1.0, %v693_v24 }
0x1118   :  { %v695_v25 = vmul.f32 %v1302_v23, %v694_v40 }
0x111a   :  { %v696_v41 = vadd.f32 %v1302_v23, %v695_v25 }
0x111c   :  { %v700_v43 = vsel %vm699_vm8, %v1302_v23, %v696_v41 }
0x111d   :  { %v705_v46 = vsel %vm702_vm9, %v704_v44, %v700_v43  ;;  %vm1122_vm9 = vcmask 130048  }
0x111e   :  { %v708_v48 = vmul.f32 %v705_v46, %v1806_v55 }
0x117b   :  { %v711_v45 = vpop.permute.xlu1 %710 }
0x117c   :  { %v713_v47 = vmul.f32 %v711_v45, %v705_v46 }
0x117e   :  { %715 = vrot.lane.b32.xlu1 %v713_v47, %s1506_s18 }
0x11f0   :  { %v716_v49 = vpop.permute.xlu1 %715 }
0x11f1   :  { %v1848_v50 = vadd.f32 %v716_v49, %v708_v48 }
0x11f3   :  { %1303 = vtanh.f32 %v1848_v50 }
0x11f9   :  { %v1304_v51 = vpop.eup %1303 }
0x11fa   :  { %721 = vrot.lane.b32.xlu0 %v1304_v51, %s1505_s17 }
0x126c   :  { %v722_v52 = vpop.permute.xlu0 %721 }
0x126d   :  { %v724_v56 = vmul.f32 %v722_v52, %v705_v46 }
0x126f   :  { %726 = vrot.lane.b32.xlu1 %v724_v56, %s1506_s18 }
0x1277   :  { %785 = vrot.lane.b32.xlu1 %v1660_v29, %s1511_s23 }
0x12e1   :  { %v1853_v58 = vpop.permute.xlu1 %726 }
0x12e2   :  { %v729_v61 = vsel %vm227_vm5, %v1853_v58, %v1848_v50 }
0x12e3   :  { %1209 = vmatmul.msk.f32.vlgmr.msrb.gmra.mxu2 %vm104_vm6, %v729_v61  ;;  %1210 = vmatmul.msk.f32.vlgmr.msra.gmra.mxu1 %vm104_vm6, %v729_v61 }
0x12e4   :  { %1011 = vmatpush.msrb.mxu2 %v1569_v0 }
0x12e6   :  { %1012 = vmatpush.msrb.mxu2 %v1571_v1 }
0x12e8   :  { %1013 = vmatpush.msrb.mxu2 %v1575_v2 }
0x12ea   :  { %1014 = vmatpush.msrb.mxu2 %v1579_v3 }
0x12ec   :  { %1015 = vmatpush.msrb.mxu2 %v1583_v4 }
0x12ee   :  { %1016 = vmatpush.msrb.mxu2 %v1587_v5 }
0x12f0   :  { %1017 = vmatpush.msrb.mxu2 %v1591_v6 }
0x12f2   :  { %1018 = vmatpush.msrb.mxu2 %v1595_v7  ;;  %v786_v7 = vpop.permute.xlu1 %785 }
0x1360   :  { %v770_v55 = vpop.f32.mrf.mxu1 }
0x1361   :  { %v773_v53 = vadd.f32 %v770_v55, %v1601_v9 }
0x1363   :  { %v774_v63 = vsel %vm149_vm0, %v773_v53, -inf }
0x1364   :  { %775 = vmax.xlane.f32.xlu0 %v774_v63 }
0x1366   :  { %v750_v10 = vpop.f32.mrf.mxu2 }
0x1378   :  { %910 = vrot.lane.b32.xlu0 %v1660_v29, %s1512_s24 }
0x13d7   :  { %v776_v0 = vpop.xlane.xlu0 %775 }
0x13d8   :  { %v777_v1 = vsub.f32 %v773_v53, %v776_v0 }
0x13da   :  { %v778_v2 = vmul.f32 1.442695, %v777_v1 }
0x13dc   :  { %1305 = vpow2.f32 %v778_v2 }
0x13e2   :  { %v1306_v3 = vpop.eup %1305 }
0x13e3   :  { %v780_v4 = vsel %vm149_vm0, %v1306_v3, 0.0 }
0x13e4   :  { %781 = vadd.xlane.f32.xlu2 %v780_v4 }
0x13ea   :  { %v911_v55 = vpop.permute.xlu0 %910 }
0x1457   :  { %v782_v5 = vpop.xlane.xlu2 %781 }
0x1458   :  { %1307 = vrcp.f32 %v782_v5 }
0x145e   :  { %v1308_v6 = vpop.eup %1307 }
0x145f   :  { %v784_v8 = vmul.f32 %v1308_v6, %v1306_v3 }
0x1461   :  { %v1872_v54 = vmul.f32 %v786_v7, %v784_v8 }
0x1463   :  { %1211 = vmatmul.msk.f32.vlgmr.msra.gmra.mxu3 %vm149_vm0, %v1872_v54 }
0x14e6   :  { %v809_v11 = vpop.f32.mrf.mxu3 }
0x14e7   :  { %v810_v20 = vadd.f32 %v809_v11, %v750_v10 }
0x14e9   :  { %v812_v12 = vadd.f32 %v1678_v33, %v810_v20 }
0x14eb   :  { %1309 = vtanh.f32 %v812_v12  ;;  %v1212_v14 = vmul.f32 -1.442695, %v812_v12 }
0x14ed   :  { %1311 = vpow2.f32 %v1212_v14 }
0x14f1   :  { %v1310_v13 = vpop.eup %1309 }
0x14f2   :  { %835 = vrot.lane.b32.xlu2 %v1310_v13, %s1505_s17 }
0x14f3   :  { %v1312_v15 = vpop.eup %1311 }
0x14f4   :  { %v816_v16 = vadd.f32 1.0, %v1312_v15 }
0x14f6   :  { %1313 = vrcp.f32 %v816_v16  ;;  %v828_v38 = vand.u32 2147483648, %v816_v16  ;;  %vm822_vm11 = vweird.f32 %v816_v16  ;;  %v826_v39 = vand.u32 2147483647, %v816_v16 }
0x14f8   :  { %v829_v19 = vor.u32 1.1754944e-38, %v828_v38  ;;  %vm827_vm13 = vcmp.eq.f32.partialorder %v826_v39, 8.507059e+37 }
0x14fc   :  { %v1314_v28 = vpop.eup %1313 }
0x14fd   :  { %v818_v32 = vmul.f32 %v1314_v28, %v816_v16  ;;  %vm823_vm10 = vweird.f32 %v1314_v28 }
0x14fe   :  { %vm824_vm12 = vmor %vm822_vm11, %vm823_vm10  ;;  %vm1124_vm10 = vcmask 195584   ;;  %vm1127_vm11 = vcmask 326656  }
0x14ff   :  { %v819_v34 = vsub.f32 1.0, %v818_v32 }
0x1501   :  { %v820_v36 = vmul.f32 %v1314_v28, %v819_v34 }
0x1503   :  { %v821_v37 = vadd.f32 %v1314_v28, %v820_v36 }
0x1505   :  { %v825_v18 = vsel %vm824_vm12, %v1314_v28, %v821_v37  ;;  %vm1129_vm12 = vcmask 392192  }
0x1506   :  { %v830_v22 = vsel %vm827_vm13, %v829_v19, %v825_v18  ;;  %vm1131_vm13 = vcmask 457728  }
0x1507   :  { %v833_v24 = vmul.f32 %v830_v22, %v1848_v50 }
0x154c   :  { %v836_v21 = vpop.permute.xlu2 %835 }
0x154d   :  { %v838_v23 = vmul.f32 %v836_v21, %v830_v22  ;;  %v1341_v21 = vld [vmem:[#allocation5] sm:$0xff] }
0x154f   :  { %840 = vrot.lane.b32.xlu1 %v838_v23, %s1506_s18 }
0x15c1   :  { %v841_v40 = vpop.permute.xlu1 %840 }
0x15c2   :  { %v843_v25 = vadd.f32 %v841_v40, %v833_v24  ;;  %v1342_v24 = vld [vmem:[#allocation2] sm:$0xff] }
0x15c4   :  { %1315 = vtanh.f32 %v843_v25 }
0x15ca   :  { %v1316_v41 = vpop.eup %1315 }
0x15cb   :  { %846 = vrot.lane.b32.xlu1 %v1316_v41, %s1505_s17 }
0x163d   :  { %v847_v26 = vpop.permute.xlu1 %846 }
0x163e   :  { %v1881_v42 = vmul.f32 %v847_v26, %v830_v22 }
0x1640   :  { %851 = vrot.lane.b32.xlu1 %v1881_v42, %s1506_s18 }
0x16b2   :  { %v852_v43 = vpop.permute.xlu1 %851 }
0x16b3   :  { %v854_v44 = vsel %vm227_vm5, %v852_v43, %v843_v25 }
0x16b4   :  { %1213 = vmatmul.msk.f32.vlgmr.msra.gmra.mxu0 %vm104_vm6, %v854_v44  ;;  %1214 = vmatmul.msk.f32.vlgmr.msrb.gmra.mxu3 %vm104_vm6, %v854_v44 }
0x1731   :  { %v875_v63 = vpop.f32.mrf.mxu0 }
0x1737   :  { %v895_v45 = vpop.f32.mrf.mxu3 }
0x1738   :  { %v898_v46 = vadd.f32 %v895_v45, %v1601_v9 }
0x173a   :  { %v899_v47 = vsel %vm149_vm0, %v898_v46, -inf }
0x173b   :  { %900 = vmax.xlane.f32.xlu2 %v899_v47 }
0x17ae   :  { %v901_v48 = vpop.xlane.xlu2 %900 }
0x17af   :  { %v902_v49 = vsub.f32 %v898_v46, %v901_v48 }
0x17b1   :  { %v903_v50 = vmul.f32 1.442695, %v902_v49  ;;  %v1343_v49 = vld [vmem:[%s1956_s4] ss:$0 sm:$0xff]  ;;  %s1517_s4 = smov 48  }
0x17b3   :  { %1317 = vpow2.f32 %v903_v50 }
0x17b9   :  { %v1318_v51 = vpop.eup %1317 }
0x17ba   :  { %v905_v52 = vsel %vm149_vm0, %v1318_v51, 0.0 }
0x17bb   :  { %906 = vadd.xlane.f32.xlu1 %v905_v52 }
0x182e   :  { %v907_v56 = vpop.xlane.xlu1 %906 }
0x182f   :  { %1319 = vrcp.f32 %v907_v56 }
0x1835   :  { %v1320_v61 = vpop.eup %1319 }
0x1836   :  { %v909_v53 = vmul.f32 %v1320_v61, %v1318_v51 }
0x1838   :  { %v1892_v9 = vmul.f32 %v911_v55, %v909_v53 }
0x183a   :  { %1215 = vmatmul.msk.f32.vlgmr.msra.gmra.mxu2 %vm149_vm0, %v1892_v9 }
0x18bd   :  { %v934_v29 = vpop.f32.mrf.mxu2 }
0x18be   :  { %v935_v0 = vadd.f32 %v934_v29, %v875_v63 }
0x18c0   :  { %v937_v1 = vadd.f32 %v1678_v33, %v935_v0 }
0x18c2   :  { %1321 = vtanh.f32 %v937_v1  ;;  %v1216_v3 = vmul.f32 -1.442695, %v937_v1 }
0x18c4   :  { %1323 = vpow2.f32 %v1216_v3 }
0x18c8   :  { %v1322_v2 = vpop.eup %1321 }
0x18c9   :  { %960 = vrot.lane.b32.xlu0 %v1322_v2, %s1505_s17 }
0x18ca   :  { %v1324_v4 = vpop.eup %1323 }
0x18cb   :  { %v941_v5 = vadd.f32 1.0, %v1324_v4 }
0x18cd   :  { %1325 = vrcp.f32 %v941_v5  ;;  %v953_v20 = vand.u32 2147483648, %v941_v5  ;;  %vm947_vm15 = vweird.f32 %v941_v5  ;;  %v951_v12 = vand.u32 2147483647, %v941_v5 }
0x18cf   :  { %v954_v13 = vor.u32 1.1754944e-38, %v953_v20  ;;  %vm952_vm2 = vcmp.eq.f32.partialorder %v951_v12, 8.507059e+37 }
0x18d3   :  { %v1326_v6 = vpop.eup %1325 }
0x18d4   :  { %v943_v7 = vmul.f32 %v1326_v6, %v941_v5  ;;  %vm948_vm14 = vweird.f32 %v1326_v6 }
0x18d5   :  { %vm949_vm1 = vmor %vm947_vm15, %vm948_vm14 }
0x18d6   :  { %v944_v8 = vsub.f32 1.0, %v943_v7 }
0x18d8   :  { %v945_v10 = vmul.f32 %v1326_v6, %v944_v8 }
0x18da   :  { %v946_v11 = vadd.f32 %v1326_v6, %v945_v10 }
0x18dc   :  { %v950_v33 = vsel %vm949_vm1, %v1326_v6, %v946_v11 }
0x18dd   :  { %v955_v15 = vsel %vm952_vm2, %v954_v13, %v950_v33 }
0x18de   :  { %v958_v28 = vmul.f32 %v955_v15, %v843_v25 }
0x193b   :  { %v961_v14 = vpop.permute.xlu0 %960 }
0x193c   :  { %v963_v16 = vmul.f32 %v961_v14, %v955_v15 }
0x193e   :  { %965 = vrot.lane.b32.xlu0 %v963_v16, %s1506_s18 }
0x19b0   :  { %v966_v32 = vpop.permute.xlu0 %965 }
0x19b1   :  { %v1899_v34 = vadd.f32 %v966_v32, %v958_v28 }
0x19b3   :  { %1327 = vtanh.f32 %v1899_v34 }
0x19b9   :  { %v1328_v36 = vpop.eup %1327 }
0x19ba   :  { %971 = vrot.lane.b32.xlu2 %v1328_v36, %s1505_s17 }
0x1a14   :  { %v972_v37 = vpop.permute.xlu2 %971 }
0x1a15   :  { %v974_v38 = vmul.f32 %v972_v37, %v955_v15 }
0x1a17   :  { %976 = vrot.lane.b32.xlu0 %v974_v38, %s1506_s18 }
0x1a89   :  { %v977_v39 = vpop.permute.xlu0 %976 }
0x1a8a   :  { %v979_v18 = vsel %vm227_vm5, %v977_v39, %v1899_v34 }
0x1a8b   :  { %1217 = vmatmul.msk.f32.vlgmr.msrb.gmra.mxu1 %vm104_vm6, %v979_v18  ;;  %1218 = vmatmul.msk.f32.vlgmr.msrb.gmra.mxu2 %vm104_vm6, %v979_v18 }
0x1b0e   :  { %v1020_v19 = vpop.f32.mrf.mxu2 }
0x1b0f   :  { %v1023_v22 = vadd.f32 %v1341_v21, %v1020_v19 }
0x1b11   :  { %v1024_v23 = vsel %vm149_vm0, %v1023_v22, -inf }
0x1b12   :  { %1025 = vmax.xlane.f32.xlu1 %v1024_v23 }
0x1b2b   :  { %1035 = vrot.lane.b32.xlu1 %v1342_v24, %s1513_s25 }
0x1b33   :  { %1100 = vrot.lane.b32.xlu1 %v1715_v27, %s1514_s26 }
0x1b3b   :  { %1106 = vrot.lane.b32.xlu1 %v1790_v30, %s1515_s27 }
0x1b43   :  { %1135 = vrot.lane.b32.xlu1 %v1735_v57, %s1505_s17  ;;  %v1000_v57 = vpop.f32.mrf.mxu1 }
0x1b85   :  { %v1026_v40 = vpop.xlane.xlu1 %1025 }
0x1b86   :  { %v1027_v25 = vsub.f32 %v1023_v22, %v1026_v40 }
0x1b88   :  { %v1028_v41 = vmul.f32 1.442695, %v1027_v25 }
0x1b8a   :  { %1329 = vpow2.f32 %v1028_v41 }
0x1b90   :  { %v1330_v26 = vpop.eup %1329 }
0x1b91   :  { %v1030_v43 = vsel %vm149_vm0, %v1330_v26, 0.0 }
0x1b92   :  { %1031 = vadd.xlane.f32.xlu0 %v1030_v43 }
0x1b9d   :  { %v1036_v45 = vpop.permute.xlu1 %1035 }
0x1ba5   :  { %v1101_v11 = vpop.permute.xlu1 %1100 }
0x1ba6   :  { %1112 = vrot.lane.b32.xlu0 %v1872_v54, %s1516_s28 }
0x1bae   :  { %1144 = vrot.lane.b32.xlu0 %v974_v38, %s1510_s22 }
0x1c05   :  { %v1032_v27 = vpop.xlane.xlu0 %1031 }
0x1c06   :  { %1331 = vrcp.f32 %v1032_v27 }
0x1c0c   :  { %v1332_v44 = vpop.eup %1331 }
0x1c0d   :  { %v1034_v30 = vmul.f32 %v1332_v44, %v1330_v26 }
0x1c0f   :  { %v1038_v46 = vmul.f32 %v1036_v45, %v1034_v30 }
0x1c11   :  { %1219 = vmatmul.msk.f32.vlgmr.msrb.gmra.mxu0 %vm149_vm0, %v1038_v46 }
0x1c18   :  { %v1113_v13 = vpop.permute.xlu0 %1112 }
0x1c20   :  { %v1145_v18 = vpop.permute.xlu0 %1144 }
0x1c8e   :  { %v1059_v47 = vpop.f32.mrf.mxu0 }
0x1c8f   :  { %v1060_v48 = vadd.f32 %v1059_v47, %v1000_v57 }
0x1c91   :  { %v1062_v50 = vadd.f32 %v1343_v49, %v1060_v48 }
0x1c93   :  { %1333 = vtanh.f32 %v1062_v50  ;;  %v1220_v51 = vmul.f32 -1.442695, %v1062_v50 }
0x1c95   :  { %1335 = vpow2.f32 %v1220_v51 }
0x1c99   :  { %v1334_v54 = vpop.eup %1333 }
0x1c9a   :  { %1085 = vrot.lane.b32.xlu2 %v1334_v54, %s1505_s17 }
0x1c9b   :  { %v1336_v52 = vpop.eup %1335 }
0x1c9c   :  { %v1066_v56 = vadd.f32 1.0, %v1336_v52 }
0x1c9e   :  { %1337 = vrcp.f32 %v1066_v56  ;;  %v1078_v0 = vand.u32 2147483648, %v1066_v56  ;;  %vm1072_vm4 = vweird.f32 %v1066_v56  ;;  %v1076_v1 = vand.u32 2147483647, %v1066_v56 }
0x1ca0   :  { %v1079_v3 = vor.u32 1.1754944e-38, %v1078_v0  ;;  %vm1077_vm8 = vcmp.eq.f32.partialorder %v1076_v1, 8.507059e+37 }
0x1ca4   :  { %v1338_v61 = vpop.eup %1337 }
0x1ca5   :  { %v1068_v55 = vmul.f32 %v1338_v61, %v1066_v56  ;;  %vm1073_vm3 = vweird.f32 %v1338_v61 }
0x1ca6   :  { %vm1074_vm7 = vmor %vm1072_vm4, %vm1073_vm3 }
0x1ca7   :  { %v1069_v53 = vsub.f32 1.0, %v1068_v55 }
0x1ca9   :  { %v1070_v63 = vmul.f32 %v1338_v61, %v1069_v53 }
0x1cab   :  { %v1071_v29 = vadd.f32 %v1338_v61, %v1070_v63 }
0x1cad   :  { %v1075_v2 = vsel %vm1074_vm7, %v1338_v61, %v1071_v29 }
0x1cae   :  { %v1080_v5 = vsel %vm1077_vm8, %v1079_v3, %v1075_v2 }
0x1caf   :  { %v1083_v7 = vmul.f32 %v1080_v5, %v1899_v34 }
0x1cf4   :  { %v1086_v4 = vpop.permute.xlu2 %1085 }
0x1cf5   :  { %v1088_v6 = vmul.f32 %v1086_v4, %v1080_v5 }
0x1cf7   :  { %1090 = vrot.lane.b32.xlu2 %v1088_v6, %s1506_s18 }
0x1cff   :  { %1103 = vrot.lane.b32.xlu2 %v1749_v17, %s1503_s16  ;;  %v1121_v17 = vsel %vm149_vm0, %v1663_v31, %v1101_v11  ;;  %vm1149_vm0 = vcmask 785408  }
0x1d07   :  { %1109 = vrot.lane.b32.xlu2 %v1832_v35, %s1506_s18 }
0x1d0f   :  { %1115 = vrot.lane.b32.xlu2 %v1892_v9, %s1517_s4 }
0x1d17   :  { %1141 = vrot.lane.b32.xlu2 %v1881_v42, %s1505_s17  ;;  %v1107_v42 = vpop.permute.xlu1 %1106 }
0x1d1f   :  { %1138 = vrot.lane.b32.xlu2 %v1769_v60, %s1510_s22  ;;  %v1136_v28 = vpop.permute.xlu1 %1135 }
0x1d20   :  { %v1147_v32 = vsel %vm227_vm5, %v1688_v59, %v1136_v28 }
0x1d51   :  { %v1091_v8 = vpop.permute.xlu2 %1090 }
0x1d52   :  { %v1093_v10 = vadd.f32 %v1091_v8, %v1083_v7 }
0x1d54   :  { %1339 = vtanh.f32 %v1093_v10 }
0x1d59   :  { %v1104_v35 = vpop.permute.xlu2 %1103 }
0x1d5a   :  { %v1340_v20 = vpop.eup %1339  ;;  %v1123_v12 = vsel %vm1122_vm9, %v1121_v17, %v1104_v35 }
0x1d5b   :  { %1096 = vrot.lane.b32.xlu1 %v1340_v20, %s1505_s17  ;;  %v1125_v9 = vsel %vm1124_vm10, %v1123_v12, %v1107_v42 }
0x1d61   :  { %v1110_v33 = vpop.permute.xlu2 %1109 }
0x1d62   :  { %v1126_v60 = vsel %vm227_vm5, %v1125_v9, %v1110_v33 }
0x1d63   :  { %1118 = vrot.lane.b32.xlu1 %v1038_v46, %s1518_s7  ;;  %v1128_v14 = vsel %vm1127_vm11, %v1126_v60, %v1113_v13 }
0x1d69   :  { %v1116_v15 = vpop.permute.xlu2 %1115 }
0x1d6a   :  { %v1130_v16 = vsel %vm1129_vm12, %v1128_v14, %v1116_v15 }
0x1d71   :  { %v1142_v31 = vpop.permute.xlu2 %1141 }
0x1d72   :  { %v1151_v38 = vsel %vm227_vm5, %v1853_v58, %v1142_v31 }
0x1d73   :  { %v1152_v59 = vsel %vm104_vm6, %v1151_v38, %v1145_v18 }
0x1d79   :  { %v1139_v34 = vpop.permute.xlu2 %1138 }
0x1d7a   :  { %v1148_v36 = vsel %vm104_vm6, %v1147_v32, %v1139_v34 }
0x1d7b   :  { %v1150_v37 = vsel %vm1149_vm0, %v1148_v36, %v1810_v62 }
0x1d7c   :  { %1154 = vst [vmem:[#allocation11] sm:$0xff] %v1150_v37 }
0x1dcd   :  { %v1097_v39 = vpop.permute.xlu1 %1096 }
0x1dce   :  { %v1099_v19 = vmul.f32 %v1097_v39, %v1080_v5 }
0x1dd0   :  { %v1153_v21 = vsel %vm1149_vm0, %v1152_v59, %v1099_v19 }
0x1dd1   :  { %1155 = vst [vmem:[#allocation11 + $0x8] sm:$0xff] %v1153_v21 }
0x1dd2   :  { %1177 = dma.vmem_to_hbm [thread:$0]  %s1173_s9, 256, %s1175_s11, [#allocation12]  }
0x1dd5   :  { %v1119_v62 = vpop.permute.xlu1 %1118 }
0x1dd6   :  { %v1132_v58 = vsel %vm1131_vm13, %v1130_v16, %v1119_v62 }
0x1dd7   :  { %v1133_v22 = vsel %vm104_vm6, %v1132_v58, 0.0 }
0x1dd8   :  { %1134 = vst [vmem:[#allocation10] sm:$0xff] %v1133_v22 }
0x1dd9   :  { %1166 = dma.vmem_to_hbm [thread:$0]  %s1162_s13, 128, %s1164_s15, [#allocation4]  }
0x1dda   :  { %1494 = dma.done.wait [#allocation4], 128  }
0x1ddb   :  { %1495 = vsyncadd [#allocation4], 4294967168 }
0x1ddc   :  { %1496 = dma.done.wait [#allocation12], 256  }
0x1ddd   :  { %1497 = vsyncadd [#allocation12], 4294967040 }
0x1dde   :  { %1186 = vsyncpa [#allocation3], 1 }
0x1ddf   :  { %1187 = vsyncpa [#allocation6], 1 }
0x1de0   :  { %1188 = vsyncpa [#allocation9], 1 }
0x1de1   :  { %1189 = vsyncpa [#allocation4], 1 }
0x1de2   :  { %1190 = vsyncpa [#allocation12], 1 }

</bundles_post_ra>
